<compile_context>
chip_gen: v7x
topology: tpu7x:2x2x1
jax: 0.10.0
libtpu: 0.0.40
codegen_flags: <defaults>
</compile_context>

<pallas_src>
import functools

import jax
import jax.numpy as jnp
from jax.experimental import pallas as pl
from jax.experimental.pallas import tpu as pltpu

HPAD = 128  # hidden width padded 96 -> 128 for lane-dense MXU tiles


def _mlp_kernel(x_ref, w1_ref, b1_ref, wh_ref, bh_ref, w6_ref, b6_ref, o_ref):
    """Fused forward for one (TB, 13) batch tile:
    5x (bf16 matmul + f32 bias + ReLU), final matmul + bias, 2-class log_softmax."""
    h = x_ref[...]  # (TB, 13) bf16 (pre-cast in the wrapper)

    # Layer 1: (TB,13) x (13,128) -- f32 MXU accumulation, f32 bias.
    y = jnp.dot(h, w1_ref[...], preferred_element_type=jnp.float32) + b1_ref[...]
    h = jnp.maximum(y, 0.0).astype(jnp.bfloat16)

    # Layers 2-5: four identical (128,128) weights, statically indexed from a
    # single stacked VMEM ref (static slices of a ref cost nothing).
    for l in range(4):
        y = jnp.dot(h, wh_ref[l], preferred_element_type=jnp.float32) + bh_ref[l]
        h = jnp.maximum(y, 0.0).astype(jnp.bfloat16)

    # Output layer: (TB,128) x (128,2).
    logits = jnp.dot(h, w6_ref[...], preferred_element_type=jnp.float32) + b6_ref[...]

    # Numerically stable 2-class log_softmax using purely elementwise (VPU)
    # math -- avoids a masked cross-lane XLU reduce over a 2/128-occupied dim.
    l0 = logits[:, 0:1]
    l1 = logits[:, 1:2]
    m = jnp.maximum(l0, l1)
    lse = m + jnp.log(jnp.exp(l0 - m) + jnp.exp(l1 - m))  # (TB, 1)
    o_ref[...] = (logits - lse).astype(o_ref.dtype)


def init_params(key):
    """Deterministic init mimicking PyTorch nn.Linear default
    (U[-1/sqrt(fan_in), 1/sqrt(fan_in)]). Weights stored as (in_features, out_features)."""
    dims = [(13, 96), (96, 96), (96, 96), (96, 96), (96, 96), (96, 2)]
    params = []
    for (fan_in, fan_out) in dims:
        key, kw, kb = jax.random.split(key, 3)
        bound = 1.0 / jnp.sqrt(jnp.float32(fan_in))
        w = jax.random.uniform(kw, (fan_in, fan_out), jnp.float32, -bound, bound)
        b = jax.random.uniform(kb, (fan_out,), jnp.float32, -bound, bound)
        params.append((w, b.reshape(1, fan_out)))
    return params


def prepare_params(params):
    """One-time wrapper-side prep: zero-pad hidden width 96 -> 128, cast weights
    to bf16 (MXU-native), keep biases in f32, and stack the four identical
    hidden layers into single (4,128,128) / (4,1,128) operands."""
    def pad_w(w):
        fi, fo = w.shape
        return jnp.pad(w, ((0, HPAD - fi if fi == 96 else 0),
                           (0, HPAD - fo if fo == 96 else 0))).astype(jnp.bfloat16)

    def pad_b(b):
        fo = b.shape[-1]
        return jnp.pad(b, ((0, 0), (0, HPAD - fo if fo == 96 else 0))).astype(jnp.float32)

    (w1, b1), *hidden, (w6, b6) = params
    wh = jnp.stack([pad_w(w) for (w, _) in hidden])   # (4, 128, 128) bf16
    bh = jnp.stack([pad_b(b) for (_, b) in hidden])   # (4, 1, 128) f32
    return (pad_w(w1), pad_b(b1), wh, bh, pad_w(w6), pad_b(b6))


@functools.partial(jax.jit, static_argnames=("tb",))
def net_forward(x, prepared, tb=2048):
    B, F = x.shape
    w1, b1, wh, bh, w6, b6 = prepared

    # Effective batch tile: as large as requested, but capped so that there are
    # at least 2 grid steps whenever B allows (keeps both v7x TensorCores busy
    # via the "parallel" axis); always a multiple of 8 sublanes.
    tb_eff = min(tb, (B + 1) // 2)
    tb_eff = max(8, -(-tb_eff // 8) * 8)

    n_blocks = pl.cdiv(B, tb_eff)
    Bp = n_blocks * tb_eff

    # Pre-cast x once (halves its HBM traffic, removes the in-kernel cast) and
    # pad the batch with zeros so every grid step sees a full tile. Padded rows
    # are computed (bias-driven log-probs) and sliced off below; all ops are
    # row-wise so valid rows are unaffected.
    x = x.astype(jnp.bfloat16)
    if Bp != B:
        x = jnp.pad(x, ((0, Bp - B), (0, 0)))

    # x / out are tiled along batch (double-buffered HBM<->VMEM); weights and
    # biases use constant block indices so they stay resident in VMEM.
    in_specs = [
        pl.BlockSpec((tb_eff, F), lambda i: (i, 0)),
        pl.BlockSpec(w1.shape, lambda i: (0, 0)),
        pl.BlockSpec(b1.shape, lambda i: (0, 0)),
        pl.BlockSpec(wh.shape, lambda i: (0, 0, 0)),
        pl.BlockSpec(bh.shape, lambda i: (0, 0, 0)),
        pl.BlockSpec(w6.shape, lambda i: (0, 0)),
        pl.BlockSpec(b6.shape, lambda i: (0, 0)),
    ]
    out_specs = pl.BlockSpec((tb_eff, 2), lambda i: (i, 0))

    weight_bytes = sum(int(a.size) * a.dtype.itemsize for a in prepared)
    cost = pl.CostEstimate(
        flops=2 * Bp * (13 * HPAD + 4 * HPAD * HPAD + HPAD * 2),
        transcendentals=3 * Bp,  # 2x exp + 1x log per row
        bytes_accessed=Bp * (13 * 2 + 2 * 4) + weight_bytes,
    )

    out = pl.pallas_call(
        _mlp_kernel,
        out_shape=jax.ShapeDtypeStruct((Bp, 2), jnp.float32),
        grid=(n_blocks,),
        in_specs=in_specs,
        out_specs=out_specs,
        compiler_params=pltpu.CompilerParams(
            dimension_semantics=("parallel",),
            # Large tiles keep several (tb,128) f32 temporaries live; raise the
            # scoped-VMEM limit past v5e's 16 MiB default (<= 48 MiB, v7x-safe).
            vmem_limit_bytes=(48 * 1024 * 1024) if tb_eff >= 4096 else None,
        ),
        cost_estimate=cost,
    )(x, *prepared)

    return out[:B]


def reference_forward_bf16(x, prepared):
    """Pure-JAX reference matching the kernel's bf16-input / f32-accum math."""
    w1, b1, wh, bh, w6, b6 = prepared
    h = x.astype(jnp.bfloat16)
    y = jnp.dot(h, w1, preferred_element_type=jnp.float32) + b1
    h = jnp.maximum(y, 0.0).astype(jnp.bfloat16)
    for l in range(4):
        y = jnp.dot(h, wh[l], preferred_element_type=jnp.float32) + bh[l]
        h = jnp.maximum(y, 0.0).astype(jnp.bfloat16)
    logits = jnp.dot(h, w6, preferred_element_type=jnp.float32) + b6
    return jax.nn.log_softmax(logits, axis=-1)


def reference_forward_f32(x, params):
    """Full-precision reference of the original PyTorch module semantics."""
    h = x
    for (w, b) in params[:-1]:
        h = jnp.maximum(h @ w + b, 0.0)
    w, b = params[-1]
    logits = h @ w + b
    return jax.nn.log_softmax(logits, axis=-1)


if __name__ == "__main__":
    key = jax.random.PRNGKey(0)
    kp, kx = jax.random.split(key)
    params = init_params(kp)
    prepared = prepare_params(params)

    B = 256  # small batch; the >=2-blocks cap gives a 2-step grid (tile = 128)
    x = jax.random.normal(kx, (B, 13), jnp.float32)

    out = net_forward(x, prepared)
    jax.block_until_ready(out)
    assert out.shape == (B, 2)

    # Exact-math reference (same bf16 casts + f32 accumulation as the kernel).
    ref_bf16 = reference_forward_bf16(x, prepared)
    assert jnp.allclose(out, ref_bf16, atol=1e-4, rtol=1e-4)

    # Loose check against the pure-f32 PyTorch-equivalent forward.
    ref_f32 = reference_forward_f32(x, params)
    assert jnp.allclose(out, ref_f32, atol=1e-1, rtol=1e-1)

    print("KERNEL_OK")
</pallas_src>

<mosaic_0001>
module attributes {stable_mosaic.version = 11 : i64} {
  func.func @_mlp_kernel(%arg0: i32, %arg1: memref<128x13xbf16, #tpu.memory_space<vmem>>, %arg2: memref<13x128xbf16, #tpu.memory_space<vmem>>, %arg3: memref<1x128xf32, #tpu.memory_space<vmem>>, %arg4: memref<4x128x128xbf16, #tpu.memory_space<vmem>>, %arg5: memref<4x1x128xf32, #tpu.memory_space<vmem>>, %arg6: memref<128x2xbf16, #tpu.memory_space<vmem>>, %arg7: memref<1x2xf32, #tpu.memory_space<vmem>>, %arg8: memref<128x2xf32, #tpu.memory_space<vmem>>) attributes {dimension_semantics = [#tpu.dimension_semantics<parallel>], iteration_bounds = array<i64: 2>, scalar_prefetch = 0 : i64, scratch_operands = 0 : i64, tpu.core_type = #tpu.core_type<tc>, window_params = [{transform_indices = @transform_0, window_bounds = array<i64: 128, 13>}, {pipeline_mode = #tpu.pipeline_mode<synchronous>, transform_indices = @transform_1, window_bounds = array<i64: 13, 128>}, {pipeline_mode = #tpu.pipeline_mode<synchronous>, transform_indices = @transform_2, window_bounds = array<i64: 1, 128>}, {pipeline_mode = #tpu.pipeline_mode<synchronous>, transform_indices = @transform_3, window_bounds = array<i64: 4, 128, 128>}, {pipeline_mode = #tpu.pipeline_mode<synchronous>, transform_indices = @transform_4, window_bounds = array<i64: 4, 1, 128>}, {pipeline_mode = #tpu.pipeline_mode<synchronous>, transform_indices = @transform_5, window_bounds = array<i64: 128, 2>}, {pipeline_mode = #tpu.pipeline_mode<synchronous>, transform_indices = @transform_6, window_bounds = array<i64: 1, 2>}, {transform_indices = @transform_7, window_bounds = array<i64: 128, 2>}]} {
    %c0 = arith.constant 0 : index
    %c0_0 = arith.constant 0 : index
    %0 = vector.load %arg1[%c0, %c0_0] : memref<128x13xbf16, #tpu.memory_space<vmem>>, vector<128x13xbf16>
    %c0_1 = arith.constant 0 : index
    %c0_2 = arith.constant 0 : index
    %1 = vector.load %arg2[%c0_1, %c0_2] : memref<13x128xbf16, #tpu.memory_space<vmem>>, vector<13x128xbf16>
    %cst = arith.constant dense<0.000000e+00> : vector<128x128xf32>
    %2 = tpu.matmul %0, %1, %cst {dimension_numbers = #tpu.dot_dimension_numbers<[1], [0], [0], [1], [0, 0, 1, 1], [], []>} : vector<128x13xbf16>, vector<13x128xbf16>, vector<128x128xf32> -> vector<128x128xf32>
    %c0_3 = arith.constant 0 : index
    %c0_4 = arith.constant 0 : index
    %3 = vector.load %arg3[%c0_3, %c0_4] : memref<1x128xf32, #tpu.memory_space<vmem>>, vector<1x128xf32>
    %4 = vector.broadcast %3 : vector<1x128xf32> to vector<128x128xf32>
    %5 = arith.addf %2, %4 : vector<128x128xf32>
    %cst_5 = arith.constant 0.000000e+00 : f32
    %6 = vector.broadcast %cst_5 : f32 to vector<128x128xf32>
    %7 = arith.maximumf %5, %6 : vector<128x128xf32>
    %8 = arith.truncf %7 : vector<128x128xf32> to vector<128x128xbf16>
    %c0_6 = arith.constant 0 : index
    %c0_7 = arith.constant 0 : index
    %c0_8 = arith.constant 0 : index
    %9 = vector.load %arg4[%c0_6, %c0_7, %c0_8] : memref<4x128x128xbf16, #tpu.memory_space<vmem>>, vector<1x128x128xbf16>
    %10 = vector.shape_cast %9 : vector<1x128x128xbf16> to vector<128x128xbf16>
    %cst_9 = arith.constant dense<0.000000e+00> : vector<128x128xf32>
    %11 = tpu.matmul %8, %10, %cst_9 {dimension_numbers = #tpu.dot_dimension_numbers<[1], [0], [0], [1], [0, 0, 1, 1], [], []>} : vector<128x128xbf16>, vector<128x128xbf16>, vector<128x128xf32> -> vector<128x128xf32>
    %c0_10 = arith.constant 0 : index
    %c0_11 = arith.constant 0 : index
    %c0_12 = arith.constant 0 : index
    %12 = vector.load %arg5[%c0_10, %c0_11, %c0_12] : memref<4x1x128xf32, #tpu.memory_space<vmem>>, vector<1x1x128xf32>
    %13 = vector.shape_cast %12 : vector<1x1x128xf32> to vector<1x128xf32>
    %14 = vector.broadcast %13 : vector<1x128xf32> to vector<128x128xf32>
    %15 = arith.addf %11, %14 : vector<128x128xf32>
    %cst_13 = arith.constant 0.000000e+00 : f32
    %16 = vector.broadcast %cst_13 : f32 to vector<128x128xf32>
    %17 = arith.maximumf %15, %16 : vector<128x128xf32>
    %18 = arith.truncf %17 : vector<128x128xf32> to vector<128x128xbf16>
    %c1 = arith.constant 1 : index
    %c0_14 = arith.constant 0 : index
    %c0_15 = arith.constant 0 : index
    %19 = vector.load %arg4[%c1, %c0_14, %c0_15] : memref<4x128x128xbf16, #tpu.memory_space<vmem>>, vector<1x128x128xbf16>
    %20 = vector.shape_cast %19 : vector<1x128x128xbf16> to vector<128x128xbf16>
    %cst_16 = arith.constant dense<0.000000e+00> : vector<128x128xf32>
    %21 = tpu.matmul %18, %20, %cst_16 {dimension_numbers = #tpu.dot_dimension_numbers<[1], [0], [0], [1], [0, 0, 1, 1], [], []>} : vector<128x128xbf16>, vector<128x128xbf16>, vector<128x128xf32> -> vector<128x128xf32>
    %c1_17 = arith.constant 1 : index
    %c0_18 = arith.constant 0 : index
    %c0_19 = arith.constant 0 : index
    %22 = vector.load %arg5[%c1_17, %c0_18, %c0_19] : memref<4x1x128xf32, #tpu.memory_space<vmem>>, vector<1x1x128xf32>
    %23 = vector.shape_cast %22 : vector<1x1x128xf32> to vector<1x128xf32>
    %24 = vector.broadcast %23 : vector<1x128xf32> to vector<128x128xf32>
    %25 = arith.addf %21, %24 : vector<128x128xf32>
    %cst_20 = arith.constant 0.000000e+00 : f32
    %26 = vector.broadcast %cst_20 : f32 to vector<128x128xf32>
    %27 = arith.maximumf %25, %26 : vector<128x128xf32>
    %28 = arith.truncf %27 : vector<128x128xf32> to vector<128x128xbf16>
    %c2 = arith.constant 2 : index
    %c0_21 = arith.constant 0 : index
    %c0_22 = arith.constant 0 : index
    %29 = vector.load %arg4[%c2, %c0_21, %c0_22] : memref<4x128x128xbf16, #tpu.memory_space<vmem>>, vector<1x128x128xbf16>
    %30 = vector.shape_cast %29 : vector<1x128x128xbf16> to vector<128x128xbf16>
    %cst_23 = arith.constant dense<0.000000e+00> : vector<128x128xf32>
    %31 = tpu.matmul %28, %30, %cst_23 {dimension_numbers = #tpu.dot_dimension_numbers<[1], [0], [0], [1], [0, 0, 1, 1], [], []>} : vector<128x128xbf16>, vector<128x128xbf16>, vector<128x128xf32> -> vector<128x128xf32>
    %c2_24 = arith.constant 2 : index
    %c0_25 = arith.constant 0 : index
    %c0_26 = arith.constant 0 : index
    %32 = vector.load %arg5[%c2_24, %c0_25, %c0_26] : memref<4x1x128xf32, #tpu.memory_space<vmem>>, vector<1x1x128xf32>
    %33 = vector.shape_cast %32 : vector<1x1x128xf32> to vector<1x128xf32>
    %34 = vector.broadcast %33 : vector<1x128xf32> to vector<128x128xf32>
    %35 = arith.addf %31, %34 : vector<128x128xf32>
    %cst_27 = arith.constant 0.000000e+00 : f32
    %36 = vector.broadcast %cst_27 : f32 to vector<128x128xf32>
    %37 = arith.maximumf %35, %36 : vector<128x128xf32>
    %38 = arith.truncf %37 : vector<128x128xf32> to vector<128x128xbf16>
    %c3 = arith.constant 3 : index
    %c0_28 = arith.constant 0 : index
    %c0_29 = arith.constant 0 : index
    %39 = vector.load %arg4[%c3, %c0_28, %c0_29] : memref<4x128x128xbf16, #tpu.memory_space<vmem>>, vector<1x128x128xbf16>
    %40 = vector.shape_cast %39 : vector<1x128x128xbf16> to vector<128x128xbf16>
    %cst_30 = arith.constant dense<0.000000e+00> : vector<128x128xf32>
    %41 = tpu.matmul %38, %40, %cst_30 {dimension_numbers = #tpu.dot_dimension_numbers<[1], [0], [0], [1], [0, 0, 1, 1], [], []>} : vector<128x128xbf16>, vector<128x128xbf16>, vector<128x128xf32> -> vector<128x128xf32>
    %c3_31 = arith.constant 3 : index
    %c0_32 = arith.constant 0 : index
    %c0_33 = arith.constant 0 : index
    %42 = vector.load %arg5[%c3_31, %c0_32, %c0_33] : memref<4x1x128xf32, #tpu.memory_space<vmem>>, vector<1x1x128xf32>
    %43 = vector.shape_cast %42 : vector<1x1x128xf32> to vector<1x128xf32>
    %44 = vector.broadcast %43 : vector<1x128xf32> to vector<128x128xf32>
    %45 = arith.addf %41, %44 : vector<128x128xf32>
    %cst_34 = arith.constant 0.000000e+00 : f32
    %46 = vector.broadcast %cst_34 : f32 to vector<128x128xf32>
    %47 = arith.maximumf %45, %46 : vector<128x128xf32>
    %48 = arith.truncf %47 : vector<128x128xf32> to vector<128x128xbf16>
    %c0_35 = arith.constant 0 : index
    %c0_36 = arith.constant 0 : index
    %49 = vector.load %arg6[%c0_35, %c0_36] : memref<128x2xbf16, #tpu.memory_space<vmem>>, vector<128x2xbf16>
    %cst_37 = arith.constant dense<0.000000e+00> : vector<128x2xf32>
    %50 = tpu.matmul %48, %49, %cst_37 {dimension_numbers = #tpu.dot_dimension_numbers<[1], [0], [0], [1], [0, 0, 1, 1], [], []>} : vector<128x128xbf16>, vector<128x2xbf16>, vector<128x2xf32> -> vector<128x2xf32>
    %c0_38 = arith.constant 0 : index
    %c0_39 = arith.constant 0 : index
    %51 = vector.load %arg7[%c0_38, %c0_39] : memref<1x2xf32, #tpu.memory_space<vmem>>, vector<1x2xf32>
    %52 = vector.broadcast %51 : vector<1x2xf32> to vector<128x2xf32>
    %53 = arith.addf %50, %52 : vector<128x2xf32>
    %54 = vector.extract_strided_slice %53 {offsets = [0, 0], sizes = [128, 1], strides = [1, 1]} : vector<128x2xf32> to vector<128x1xf32>
    %55 = vector.extract_strided_slice %53 {offsets = [0, 1], sizes = [128, 1], strides = [1, 1]} : vector<128x2xf32> to vector<128x1xf32>
    %56 = arith.maximumf %54, %55 : vector<128x1xf32>
    %57 = arith.subf %54, %56 : vector<128x1xf32>
    %58 = math.exp %57 : vector<128x1xf32>
    %59 = arith.subf %55, %56 : vector<128x1xf32>
    %60 = math.exp %59 : vector<128x1xf32>
    %61 = arith.addf %58, %60 : vector<128x1xf32>
    %62 = math.log %61 : vector<128x1xf32>
    %63 = arith.addf %56, %62 : vector<128x1xf32>
    %64 = vector.broadcast %63 : vector<128x1xf32> to vector<128x2xf32>
    %65 = arith.subf %53, %64 : vector<128x2xf32>
    %c0_40 = arith.constant 0 : index
    %c0_41 = arith.constant 0 : index
    %66 = vector.load %arg8[%c0_40, %c0_41] : memref<128x2xf32, #tpu.memory_space<vmem>>, vector<128x2xf32>
    tpu.vector_store %arg8[%c0_40, %c0_41], %65 {strides = array<i32>} : memref<128x2xf32, #tpu.memory_space<vmem>>, vector<128x2xf32>,
    return
  }
  func.func @transform_0(%arg0: i32) -> (i32, i32) {
    %c0_i32 = arith.constant 0 : i32
    %c0_i32_0 = arith.constant 0 : i32
    return %arg0, %c0_i32 : i32, i32
  }
  func.func @transform_1(%arg0: i32) -> (i32, i32) {
    %c0_i32 = arith.constant 0 : i32
    %c0_i32_0 = arith.constant 0 : i32
    %c0_i32_1 = arith.constant 0 : i32
    return %c0_i32, %c0_i32_0 : i32, i32
  }
  func.func @transform_2(%arg0: i32) -> (i32, i32) {
    %c0_i32 = arith.constant 0 : i32
    %c0_i32_0 = arith.constant 0 : i32
    %c0_i32_1 = arith.constant 0 : i32
    return %c0_i32, %c0_i32_0 : i32, i32
  }
  func.func @transform_3(%arg0: i32) -> (i32, i32, i32) {
    %c0_i32 = arith.constant 0 : i32
    %c0_i32_0 = arith.constant 0 : i32
    %c0_i32_1 = arith.constant 0 : i32
    %c0_i32_2 = arith.constant 0 : i32
    return %c0_i32, %c0_i32_0, %c0_i32_1 : i32, i32, i32
  }
  func.func @transform_4(%arg0: i32) -> (i32, i32, i32) {
    %c0_i32 = arith.constant 0 : i32
    %c0_i32_0 = arith.constant 0 : i32
    %c0_i32_1 = arith.constant 0 : i32
    %c0_i32_2 = arith.constant 0 : i32
    return %c0_i32, %c0_i32_0, %c0_i32_1 : i32, i32, i32
  }
  func.func @transform_5(%arg0: i32) -> (i32, i32) {
    %c0_i32 = arith.constant 0 : i32
    %c0_i32_0 = arith.constant 0 : i32
    %c0_i32_1 = arith.constant 0 : i32
    return %c0_i32, %c0_i32_0 : i32, i32
  }
  func.func @transform_6(%arg0: i32) -> (i32, i32) {
    %c0_i32 = arith.constant 0 : i32
    %c0_i32_0 = arith.constant 0 : i32
    %c0_i32_1 = arith.constant 0 : i32
    return %c0_i32, %c0_i32_0 : i32, i32
  }
  func.func @transform_7(%arg0: i32) -> (i32, i32) {
    %c0_i32 = arith.constant 0 : i32
    %c0_i32_0 = arith.constant 0 : i32
    return %arg0, %c0_i32 : i32, i32
  }
}

</mosaic_0001>

<bundles_post_ra>
// kernel: net_forward.1
= control target key start
LH: loop header
LB: loop body
LE: loop exit
PB: predicated region body
PF: predicated region fallthrough
CT: control target
= control target key end

     0   :  { %12 = vsyncpa [#allocation3], 0  ;;  %s2675_s24 = smov 0   ;;  %s3204_s0 = inlined_call_operand.vmem [shape: bf16[256,13], index: 0, kind: input, shape index: {}]   ;;  %s3205_s1 = inlined_call_operand.vmem [shape: bf16[13,128], index: 1, kind: input, shape index: {}]   ;;  %s3206_s2 = inlined_call_operand.hbm [shape: f32[1,128], index: 2, kind: input, shape index: {}]   ;;  %s3207_s3 = inlined_call_operand.vmem [shape: bf16[4,128,128], index: 3, kind: input, shape index: {}]   ;;  %s3208_s4 = inlined_call_operand.vmem [shape: f32[4,1,128], index: 4, kind: input, shape index: {}]   ;;  %s3209_s5 = inlined_call_operand.vmem [shape: bf16[128,2], index: 5, kind: input, shape index: {}]   ;;  %s3210_s6 = inlined_call_operand.vmem [shape: f32[1,2], index: 6, kind: input, shape index: {}]   ;;  %s3211_s7 = inlined_call_operand.vmem [shape: f32[256,2], index: 7, kind: output, shape index: {}]  }
   0x1 LB: > { %s2010_s25 = sadd.s32 4294967295, %s2628_s24   ;;  %p2012_p0 = scmp.ge.s32.totalorder %s2628_s24, 1  ;;  %s2628_s24 = sphi %s2675_s24, %s18_s24  }
   0x2   : > { %p201_p1 = scmp.lt.s32.totalorder %s2628_s24, 3  ;;  %p2689_p3 = scmp.eq.s32.totalorder %s2010_s25, 0 }
   0x3   : > { %s2630_s28 = smov [#allocation2]   ;;  %s2590_s10 = scalar_lea.hbm %s3206_s2, 16 }
   0x4   : > { %p2683_p2 = pnand %p2012_p0, %p201_p1  ;;  %s217_s29 = sshll.u32 %s2630_s28, 4  ;;  %s218_s29 = int_to_ptr.vmem [resolvable:$true] %s217_s29 }
   0x5   : > { %s3216_s27 = scalar_select %p2689_p3, 1, 0 }
   0x6   : > { %s3215_s26 = scalar_select %p2683_p2, 1, 0 }
   0x7   : > { %p2424_p4 = pneg %p2683_p2  ;;  %p2591_p6 = scmp.ne.s32.totalorder %s3206_s2, %s2590_s10 }
   0x8   : > { %p2597_p10 = scmp.lt.u32.totalorder %s2590_s10, %s3206_s2 }
   0x9   : > { %p2697_p5 = pnand %p2689_p3, %p2424_p4 }
   0xb   : > { %p2592_p7 = pneg %p2697_p5 }
   0xd   : > { %p2593_p8 = pnand %p2592_p7, %p2591_p6 }
   0xf   : > { %p2594_p9 = pneg %p2593_p8 }
  0x11   : > { %p2599_p11 = pnand %p2597_p10, %p2594_p9 }
  0x13   : > { %2602 = shalt.err (!%p2599_p11)
}
  0x14   : > { %s2603_s15 = scalar_lea.vmem %s218_s29, 16  ;;  %s2610_s16 = scalar_lea.vmem %s218_s29, 32 }
  0x15   : > { %p2604_p12 = scmp.ne.s32.totalorder %s218_s29, %s2603_s15  ;;  %p2611_p1 = scmp.lt.s32.totalorder %s218_s29, %s218_s29 }
  0x16   : > { %p2612_p4 = scmp.lt.s32.totalorder %s2610_s16, %s2603_s15 }
  0x17   : > { %p2606_p13 = pnand %p2604_p12, %p2592_p7 }
  0x18   : > { %p2613_p3 = por %p2612_p4, %p2611_p1 }
  0x19   : > { %p2607_p0 = pneg %p2606_p13 }
  0x1b   : > { %p2614_p2 = pnand %p2613_p3, %p2607_p0 }
  0x1d   : > { %2617 = shalt.err (!%p2614_p2)
}
  0x1e   : > { %2427 = dma.hbm_to_vmem [thread:$0]  (!%p2697_p5), %s3206_s2, 16, %s218_s29, [#allocation3]  }
  0x1f   : > { %p3218_p6 = scmp.ne.s32.totalorder %s3215_s26, 0 }
  0x20   : > { %p3219_p8 = scmp.ne.s32.totalorder (!%p3218_p6), %s3216_s27, 0 }
  0x21   : > { %251 = sbr.rel (%p3218_p6) target bundleno = 1917 (0x77d), region = 48 }
  0x28   : > { %2623 = dma.done.wait (%p3219_p8), [#allocation3], 16  }
  0x29   : > { %2625 = vsyncadd (%p3219_p8), [#allocation3], 4294967280  ;;  %vm391_vm0 = vcmask 1045504   ;;  %s2017_s19 = sshll.u32 %s2010_s25, 4  ;;  %vm392_vm1 = vcmask 1046528   ;;  %v2631_v0 = vmov 65535  }
  0x2a   : > { %p284_p2 = scmp.lt.s32.totalorder %s2017_s19, 31  ;;  %v393_v1 = vsel %vm391_vm0, 4294967295, %v2631_v0  ;;  %vm366_vm2 = vcmask 105472   ;;  %v2445_v3 = vld [vmem:[%s3205_s1] sm:$0x7f]   ;;  %v2455_v9 = vld [vmem:[%s3207_s3 + $0x8] sm:$0xff]  }
  0x2b   : > { %v394_v2 = vsel %vm392_vm1, %v393_v1, 0  ;;  %v2454_v8 = vld [vmem:[%s3207_s3] sm:$0xff]   ;;  %v2456_v12 = vld [vmem:[%s3207_s3 + $0x10] sm:$0xff]   ;;  %v2457_v13 = vld [vmem:[%s3207_s3 + $0x18] sm:$0xff]   ;;  %s2632_s10 = smov 127   ;;  %s2633_s11 = smov 1  }
  0x2c   : > { %s3221_s19 = smov (!%p284_p2, %s2017_s19), 31  ;;  %v396_v5 = vand.u32 %v2445_v3, %v394_v2  ;;  %2244 = vmatprep.subr.bf16.mxu1 %v2454_v8  ;;  %v2458_v16 = vld [vmem:[%s3207_s3 + $0x20] sm:$0xff]   ;;  %v2459_v17 = vld [vmem:[%s3207_s3 + $0x28] sm:$0xff]   ;;  %v2460_v19 = vld [vmem:[%s3207_s3 + $0x30] sm:$0xff]   ;;  %vm1925_vm3 = vcmask 15360  }
  0x2d   : > { %s2018_s20 = sshll.u32 %s3221_s19, 2  ;;  %2245 = vmatpush3.bf16.msra.mxu1 %v2454_v8  ;;  %v2461_v20 = vld [vmem:[%s3207_s3 + $0x38] sm:$0xff]   ;;  %v2462_v21 = vld [vmem:[%s3207_s3 + $0x40] sm:$0xff]   ;;  %v2463_v22 = vld [vmem:[%s3207_s3 + $0x48] sm:$0xff]   ;;  %s2020_s12 = sshll.u32 %s3221_s19, 3 }
  0x2e   : > { %s2731_s23 = scalar_lea.vmem %s3204_s0, %s2018_s20  ;;  %2226 = vmatprep.subr.bf16.mxu0 %v396_v5  ;;  %2246 = vmatprep.subr.bf16.mxu1 %v2455_v9  ;;  %v2464_v23 = vld [vmem:[%s3207_s3 + $0x50] sm:$0xff]   ;;  %v2465_v24 = vld [vmem:[%s3207_s3 + $0x58] sm:$0xff]   ;;  %v2466_v25 = vld [vmem:[%s3207_s3 + $0x60] sm:$0xff]   ;;  %s3151_s15 = scalar_lea.vmem %s3211_s7, %s2020_s12 }
  0x2f   : > { %v2446_v4 = vld [vmem:[%s2731_s23] sm:$0xff]   ;;  %v2447_v6 = vld [vmem:[%s2731_s23 + $0x8] sm:$0xff]   ;;  %2227 = vmatpush3.bf16.msra.mxu0 %v396_v5  ;;  %v2448_v7 = vld [vmem:[%s2731_s23 + $0x10] sm:$0xff]  }
  0x30   : > { %2228 = vmatprep.mubr.msk.bf16.mxu0 %vm366_vm2, %v2446_v4  ;;  %v2449_v10 = vld [vmem:[%s2731_s23 + $0x18] sm:$0xff]   ;;  %v2450_v11 = vld [vmem:[%s2731_s23 + $0x20] sm:$0xff]   ;;  %v2451_v14 = vld [vmem:[%s2731_s23 + $0x28] sm:$0xff]   ;;  %2276 = vmatprep.subr.bf16.mxu0 %v2462_v21 }
  0x31   : > { %2247 = vmatpush3.bf16.msra.mxu1 %v2455_v9  ;;  %v2452_v15 = vld [vmem:[%s2731_s23 + $0x30] sm:$0xff]   ;;  %v2453_v18 = vld [vmem:[%s2731_s23 + $0x38] sm:$0xff]   ;;  %v2467_v26 = vld [vmem:[%s3207_s3 + $0x68] sm:$0xff]  }
  0x32   : > { %2229 = vmatmul.mubr.msk.bf16.vlgmr.msra.gmra.mrb[0].mxu0 %vm366_vm2, %v2447_v6  ;;  %2248 = vmatprep.subr.bf16.mxu1 %v2456_v12  ;;  %v2021_v27 = vld [vmem:[#allocation2] ss:$0 sm:$0xff] }
  0x33   : > { %2232 = vmatprep.mubr.msk.bf16.mxu0 %vm366_vm2, %v2448_v7  ;;  %2277 = vmatpush3.bf16.msra.mxu0 %v2462_v21  ;;  %v2469_v21 = vld [vmem:[%s3207_s3 + $0x78] sm:$0xff]  }
  0x34   : > { %2278 = vmatprep.subr.bf16.mxu0 %v2463_v22 }
  0x35   : > { %2249 = vmatpush3.bf16.msra.mxu1 %v2456_v12 }
  0x36   : > { %2250 = vmatprep.subr.bf16.mxu1 %v2457_v13 }
  0x37   : > { %2279 = vmatpush3.bf16.msra.mxu0 %v2463_v22  ;;  %v2470_v22 = vld [vmem:[%s3207_s3 + $0x80] sm:$0xff]  }
  0x38   : > { %2280 = vmatprep.subr.bf16.mxu0 %v2464_v23 }
  0x39   : > { %2251 = vmatpush3.bf16.msra.mxu1 %v2457_v13 }
  0x3a   : > { %2233 = vmatmul.mubr.msk.bf16.gmra.mrb[4].mxu0 %vm366_vm2, %v2449_v10  ;;  %2252 = vmatprep.subr.bf16.mxu1 %v2458_v16 }
  0x3b   : > { %2236 = vmatprep.mubr.msk.bf16.mxu0 %vm366_vm2, %v2450_v11  ;;  %2281 = vmatpush3.bf16.msra.mxu0 %v2464_v23  ;;  %v2471_v23 = vld [vmem:[%s3207_s3 + $0x88] sm:$0xff]  }
  0x3c   : > { %2282 = vmatprep.subr.bf16.mxu0 %v2465_v24 }
  0x3d   : > { %2253 = vmatpush3.bf16.msra.mxu1 %v2458_v16 }
  0x3e   : > { %2254 = vmatprep.subr.bf16.mxu1 %v2459_v17 }
  0x3f   : > { %2283 = vmatpush3.bf16.msra.mxu0 %v2465_v24  ;;  %v2472_v24 = vld [vmem:[%s3207_s3 + $0x90] sm:$0xff]  }
  0x40   : > { %2284 = vmatprep.subr.bf16.mxu0 %v2466_v25 }
  0x41   : > { %2255 = vmatpush3.bf16.msra.mxu1 %v2459_v17 }
  0x42   : > { %2237 = vmatmul.mubr.msk.bf16.gmra.mrb[8].mxu0 %vm366_vm2, %v2451_v14  ;;  %2256 = vmatprep.subr.bf16.mxu1 %v2460_v19 }
  0x43   : > { %2240 = vmatprep.mubr.msk.bf16.mxu0 %vm366_vm2, %v2452_v15  ;;  %2285 = vmatpush3.bf16.msra.mxu0 %v2466_v25  ;;  %v2473_v25 = vld [vmem:[%s3207_s3 + $0x98] sm:$0xff]  }
  0x44   : > { %2286 = vmatprep.subr.bf16.mxu0 %v2467_v26 }
  0x45   : > { %2257 = vmatpush3.bf16.msra.mxu1 %v2460_v19 }
  0x46   : > { %2258 = vmatprep.subr.bf16.mxu1 %v2461_v20 }
  0x47   : > { %2287 = vmatpush3.bf16.msra.mxu0 %v2467_v26  ;;  %v2474_v26 = vld [vmem:[%s3207_s3 + $0xa0] sm:$0xff]  }
  0x49   : > { %2259 = vmatpush3.bf16.msra.mxu1 %v2461_v20  ;;  %v2468_v20 = vld [vmem:[%s3207_s3 + $0x70] sm:$0xff]  }
  0x4a   : > { %2241 = vmatmul.mubr.msk.bf16.gmra.mrb[12].mxu0 %vm366_vm2, %v2453_v18  ;;  %2288 = vmatprep.subr.bf16.mxu0 %v2468_v20 }
  0x4b   : > { %2289 = vmatpush3.bf16.msra.mxu0 %v2468_v20  ;;  %2308 = vmatprep.subr.bf16.mxu1 %v2470_v22 }
  0x4c   : > { %2290 = vmatprep.subr.bf16.mxu0 %v2469_v21 }
  0x4f   : > { %2291 = vmatpush3.bf16.msra.mxu0 %v2469_v21  ;;  %v2476_v21 = vld [vmem:[%s3207_s3 + $0xb0] sm:$0xff]  }
 0x105   : > { %v2230_v28 = vpop.f32.mrb[0].mxu0 }
 0x106   : > { %v441_v29 = vadd.f32 %v2230_v28, %v2021_v27  ;;  %v432_v30 = vpop.f32.mrb[1].mxu0  ;;  %v2039_v28 = vld [vmem:[%s3208_s4] ss:$0 sm:$0xff] }
 0x107   : > { %v433_v31 = vadd.f32 %v2021_v27, %v432_v30  ;;  %v2231_v32 = vpop.f32.mrb[2].mxu0 }
 0x108   : > { %v444_v33 = vadd.f32 %v2231_v32, %v2021_v27  ;;  %v435_v34 = vpop.f32.mrb[3].mxu0  ;;  %v497_v36 = vmax.f32 %v441_v29, 0.0 }
 0x109   : > { %v436_v35 = vadd.f32 %v2021_v27, %v435_v34  ;;  %v495_v38 = vmax.f32 %v433_v31, 0.0 }
 0x10a   : > { %v498_v37 = vmax.f32 %v444_v33, 0.0 }
 0x10b   : > { %v496_v39 = vmax.f32 %v436_v35, 0.0 }
 0x10c   : > { %v512_v40 = vpack.c.bf16 %v498_v37, %v497_v36 }
 0x10d   : > { %v2234_v41 = vpop.f32.mrb[4].mxu0  ;;  %v511_v42 = vpack.c.bf16 %v496_v39, %v495_v38 }
 0x10e   : > { %v457_v43 = vadd.f32 %v2234_v41, %v2021_v27  ;;  %v448_v44 = vpop.f32.mrb[5].mxu0 }
 0x10f   : > { %v449_v45 = vadd.f32 %v2021_v27, %v448_v44  ;;  %v2235_v46 = vpop.f32.mrb[6].mxu0  ;;  %2260 = vmatprep.mubr.bf16.mxu1 %v511_v42 }
 0x110   : > { %v501_v47 = vmax.f32 %v457_v43, 0.0  ;;  %v460_v48 = vadd.f32 %v2235_v46, %v2021_v27  ;;  %v451_v49 = vpop.f32.mrb[7].mxu0  ;;  %2261 = vmatmul.mubr.bf16.vlgmr.msra.gmra.mrb[0].mxu1 %v512_v40 }
 0x111   : > { %v452_v50 = vadd.f32 %v2021_v27, %v451_v49  ;;  %v499_v52 = vmax.f32 %v449_v45, 0.0  ;;  %2309 = vmatpush3.bf16.msra.mxu1 %v2470_v22  ;;  %v2477_v22 = vld [vmem:[%s3207_s3 + $0xb8] sm:$0xff]  }
 0x112   : > { %v502_v51 = vmax.f32 %v460_v48, 0.0  ;;  %2310 = vmatprep.subr.bf16.mxu1 %v2471_v23 }
 0x113   : > { %v500_v53 = vmax.f32 %v452_v50, 0.0 }
 0x114   : > { %v514_v54 = vpack.c.bf16 %v502_v51, %v501_v47 }
 0x115   : > { %v513_v55 = vpack.c.bf16 %v500_v53, %v499_v52  ;;  %v2238_v56 = vpop.f32.mrb[8].mxu0  ;;  %2311 = vmatpush3.bf16.msra.mxu1 %v2471_v23  ;;  %v2478_v23 = vld [vmem:[%s3207_s3 + $0xc0] sm:$0xff]  }
 0x116   : > { %v473_v57 = vadd.f32 %v2238_v56, %v2021_v27  ;;  %v464_v58 = vpop.f32.mrb[9].mxu0  ;;  %2312 = vmatprep.subr.bf16.mxu1 %v2472_v24  ;;  %2340 = vmatprep.subr.bf16.mxu0 %v2478_v23 }
 0x117   : > { %v465_v59 = vadd.f32 %v2021_v27, %v464_v58  ;;  %v2239_v60 = vpop.f32.mrb[10].mxu0  ;;  %2264 = vmatprep.mubr.bf16.mxu1 %v513_v55 }
 0x118   : > { %v505_v61 = vmax.f32 %v473_v57, 0.0  ;;  %v476_v62 = vadd.f32 %v2239_v60, %v2021_v27  ;;  %v467_v63 = vpop.f32.mrb[11].mxu0  ;;  %2265 = vmatmul.mubr.bf16.gmra.mrb[4].mxu1 %v514_v54 }
 0x119   : > { %v468_v0 = vadd.f32 %v2021_v27, %v467_v63  ;;  %v503_v2 = vmax.f32 %v465_v59, 0.0  ;;  %2313 = vmatpush3.bf16.msra.mxu1 %v2472_v24  ;;  %v2479_v24 = vld [vmem:[%s3207_s3 + $0xc8] sm:$0xff]  }
 0x11a   : > { %v506_v1 = vmax.f32 %v476_v62, 0.0  ;;  %2314 = vmatprep.subr.bf16.mxu1 %v2473_v25 }
 0x11b   : > { %v504_v3 = vmax.f32 %v468_v0, 0.0 }
 0x11c   : > { %v516_v4 = vpack.c.bf16 %v506_v1, %v505_v61 }
 0x11d   : > { %v515_v5 = vpack.c.bf16 %v504_v3, %v503_v2  ;;  %v2242_v6 = vpop.f32.mrb[12].mxu0  ;;  %2315 = vmatpush3.bf16.msra.mxu1 %v2473_v25  ;;  %v2480_v25 = vld [vmem:[%s3207_s3 + $0xd0] sm:$0xff]  }
 0x11e   : > { %v489_v7 = vadd.f32 %v2242_v6, %v2021_v27  ;;  %v480_v8 = vpop.f32.mrb[13].mxu0  ;;  %2316 = vmatprep.subr.bf16.mxu1 %v2474_v26 }
 0x11f   : > { %v481_v9 = vadd.f32 %v2021_v27, %v480_v8  ;;  %v2243_v10 = vpop.f32.mrb[14].mxu0  ;;  %2268 = vmatprep.mubr.bf16.mxu1 %v515_v5 }
 0x120   : > { %v509_v11 = vmax.f32 %v489_v7, 0.0  ;;  %v492_v12 = vadd.f32 %v2243_v10, %v2021_v27  ;;  %v483_v13 = vpop.f32.mrb[15].mxu0  ;;  %2269 = vmatmul.mubr.bf16.gmra.mrb[8].mxu1 %v516_v4 }
 0x121   : > { %v484_v14 = vadd.f32 %v2021_v27, %v483_v13  ;;  %v507_v16 = vmax.f32 %v481_v9, 0.0  ;;  %v2475_v27 = vld [vmem:[%s3207_s3 + $0xa8] sm:$0xff]   ;;  %2317 = vmatpush3.bf16.msra.mxu1 %v2474_v26  ;;  %v2481_v26 = vld [vmem:[%s3207_s3 + $0xd8] sm:$0xff]  }
 0x122   : > { %v510_v15 = vmax.f32 %v492_v12, 0.0  ;;  %2318 = vmatprep.subr.bf16.mxu1 %v2475_v27 }
 0x123   : > { %v508_v17 = vmax.f32 %v484_v14, 0.0 }
 0x124   : > { %v518_v18 = vpack.c.bf16 %v510_v15, %v509_v11 }
 0x125   : > { %v517_v19 = vpack.c.bf16 %v508_v17, %v507_v16  ;;  %2319 = vmatpush3.bf16.msra.mxu1 %v2475_v27  ;;  %v2482_v27 = vld [vmem:[%s3207_s3 + $0xe0] sm:$0xff]  }
 0x126   : > { %2320 = vmatprep.subr.bf16.mxu1 %v2476_v21 }
 0x127   : > { %2272 = vmatprep.mubr.bf16.mxu1 %v517_v19 }
 0x128   : > { %2273 = vmatmul.mubr.bf16.gmra.mrb[12].mxu1 %v518_v18 }
 0x129   : > { %2321 = vmatpush3.bf16.msra.mxu1 %v2476_v21 }
 0x12a   : > { %2322 = vmatprep.subr.bf16.mxu1 %v2477_v22 }
 0x12d   : > { %2323 = vmatpush3.bf16.msra.mxu1 %v2477_v22  ;;  %v2484_v22 = vld [vmem:[%s3207_s3 + $0xf0] sm:$0xff]  }
 0x1e3   : > { %v2262_v29 = vpop.f32.mrb[0].mxu1 }
 0x1e4   : > { %v633_v30 = vadd.f32 %v2262_v29, %v2039_v28  ;;  %v624_v31 = vpop.f32.mrb[1].mxu1  ;;  %v2065_v29 = vld [vmem:[%s3208_s4 + $0x1] ss:$0 sm:$0xff] }
 0x1e5   : > { %v625_v32 = vadd.f32 %v2039_v28, %v624_v31  ;;  %v2263_v33 = vpop.f32.mrb[2].mxu1 }
 0x1e6   : > { %v636_v34 = vadd.f32 %v2263_v33, %v2039_v28  ;;  %v627_v35 = vpop.f32.mrb[3].mxu1  ;;  %v689_v37 = vmax.f32 %v633_v30, 0.0 }
 0x1e7   : > { %v628_v36 = vadd.f32 %v2039_v28, %v627_v35  ;;  %v687_v39 = vmax.f32 %v625_v32, 0.0 }
 0x1e8   : > { %v690_v38 = vmax.f32 %v636_v34, 0.0 }
 0x1e9   : > { %v688_v40 = vmax.f32 %v628_v36, 0.0 }
 0x1ea   : > { %v704_v41 = vpack.c.bf16 %v690_v38, %v689_v37 }
 0x1eb   : > { %v703_v42 = vpack.c.bf16 %v688_v40, %v687_v39  ;;  %v2266_v43 = vpop.f32.mrb[4].mxu1 }
 0x1ec   : > { %v649_v44 = vadd.f32 %v2266_v43, %v2039_v28  ;;  %v640_v45 = vpop.f32.mrb[5].mxu1 }
 0x1ed   : > { %v641_v46 = vadd.f32 %v2039_v28, %v640_v45  ;;  %v2267_v47 = vpop.f32.mrb[6].mxu1  ;;  %2292 = vmatprep.mubr.bf16.mxu0 %v703_v42 }
 0x1ee   : > { %v652_v48 = vadd.f32 %v2267_v47, %v2039_v28  ;;  %v643_v49 = vpop.f32.mrb[7].mxu1  ;;  %2293 = vmatmul.mubr.bf16.vlgmr.msra.gmra.mrb[16].mxu0 %v704_v41  ;;  %v693_v51 = vmax.f32 %v649_v44, 0.0 }
 0x1ef   : > { %v644_v50 = vadd.f32 %v2039_v28, %v643_v49  ;;  %v691_v53 = vmax.f32 %v641_v46, 0.0  ;;  %2341 = vmatpush3.bf16.msra.mxu0 %v2478_v23  ;;  %v2485_v23 = vld [vmem:[%s3207_s3 + $0xf8] sm:$0xff]  }
 0x1f0   : > { %v694_v52 = vmax.f32 %v652_v48, 0.0  ;;  %2342 = vmatprep.subr.bf16.mxu0 %v2479_v24 }
 0x1f1   : > { %v692_v54 = vmax.f32 %v644_v50, 0.0 }
 0x1f2   : > { %v706_v55 = vpack.c.bf16 %v694_v52, %v693_v51 }
 0x1f3   : > { %v705_v56 = vpack.c.bf16 %v692_v54, %v691_v53  ;;  %v2270_v57 = vpop.f32.mrb[8].mxu1  ;;  %2343 = vmatpush3.bf16.msra.mxu0 %v2479_v24  ;;  %v2486_v24 = vld [vmem:[%s3209_s5] sm:$0xff]  }
 0x1f4   : > { %v665_v58 = vadd.f32 %v2270_v57, %v2039_v28  ;;  %v656_v59 = vpop.f32.mrb[9].mxu1  ;;  %2344 = vmatprep.subr.bf16.mxu0 %v2480_v25  ;;  %2404 = vmatprep.subr.bf16.mxu1 %v2486_v24 }
 0x1f5   : > { %v657_v60 = vadd.f32 %v2039_v28, %v656_v59  ;;  %v2271_v61 = vpop.f32.mrb[10].mxu1  ;;  %2296 = vmatprep.mubr.bf16.mxu0 %v705_v56 }
 0x1f6   : > { %v668_v62 = vadd.f32 %v2271_v61, %v2039_v28  ;;  %v659_v63 = vpop.f32.mrb[11].mxu1  ;;  %2297 = vmatmul.mubr.bf16.gmra.mrb[20].mxu0 %v706_v55  ;;  %v697_v1 = vmax.f32 %v665_v58, 0.0 }
 0x1f7   : > { %v660_v0 = vadd.f32 %v2039_v28, %v659_v63  ;;  %v695_v3 = vmax.f32 %v657_v60, 0.0  ;;  %2345 = vmatpush3.bf16.msra.mxu0 %v2480_v25  ;;  %v2487_v25 = vld [vmem:[%s3209_s5 + $0x8] sm:$0xff]  }
 0x1f8   : > { %v698_v2 = vmax.f32 %v668_v62, 0.0  ;;  %2346 = vmatprep.subr.bf16.mxu0 %v2481_v26 }
 0x1f9   : > { %v696_v4 = vmax.f32 %v660_v0, 0.0 }
 0x1fa   : > { %v708_v5 = vpack.c.bf16 %v698_v2, %v697_v1 }
 0x1fb   : > { %v707_v6 = vpack.c.bf16 %v696_v4, %v695_v3  ;;  %v2274_v7 = vpop.f32.mrb[12].mxu1  ;;  %2347 = vmatpush3.bf16.msra.mxu0 %v2481_v26  ;;  %v2488_v26 = vld [vmem:[%s3209_s5 + $0x10] sm:$0xff]  }
 0x1fc   : > { %v681_v8 = vadd.f32 %v2274_v7, %v2039_v28  ;;  %v672_v9 = vpop.f32.mrb[13].mxu1  ;;  %2348 = vmatprep.subr.bf16.mxu0 %v2482_v27 }
 0x1fd   : > { %v673_v10 = vadd.f32 %v2039_v28, %v672_v9  ;;  %v2275_v11 = vpop.f32.mrb[14].mxu1  ;;  %2300 = vmatprep.mubr.bf16.mxu0 %v707_v6 }
 0x1fe   : > { %v684_v12 = vadd.f32 %v2275_v11, %v2039_v28  ;;  %v675_v13 = vpop.f32.mrb[15].mxu1  ;;  %2301 = vmatmul.mubr.bf16.gmra.mrb[24].mxu0 %v708_v5  ;;  %v701_v15 = vmax.f32 %v681_v8, 0.0 }
 0x1ff   : > { %v676_v14 = vadd.f32 %v2039_v28, %v675_v13  ;;  %v699_v17 = vmax.f32 %v673_v10, 0.0  ;;  %v2483_v28 = vld [vmem:[%s3207_s3 + $0xe8] sm:$0xff]   ;;  %2349 = vmatpush3.bf16.msra.mxu0 %v2482_v27  ;;  %v2866_v27 = vld [vmem:[%s3209_s5 + $0x18] sm:$0xff]  }
 0x200   : > { %v702_v16 = vmax.f32 %v684_v12, 0.0  ;;  %2350 = vmatprep.subr.bf16.mxu0 %v2483_v28 }
 0x201   : > { %v700_v18 = vmax.f32 %v676_v14, 0.0 }
 0x202   : > { %v710_v19 = vpack.c.bf16 %v702_v16, %v701_v15 }
 0x203   : > { %v709_v20 = vpack.c.bf16 %v700_v18, %v699_v17  ;;  %2351 = vmatpush3.bf16.msra.mxu0 %v2483_v28  ;;  %v2872_v28 = vld [vmem:[%s3209_s5 + $0x20] sm:$0xff]  }
 0x204   : > { %2352 = vmatprep.subr.bf16.mxu0 %v2484_v22 }
 0x205   : > { %2304 = vmatprep.mubr.bf16.mxu0 %v709_v20 }
 0x206   : > { %2305 = vmatmul.mubr.bf16.gmra.mrb[28].mxu0 %v710_v19 }
 0x207   : > { %2353 = vmatpush3.bf16.msra.mxu0 %v2484_v22 }
 0x208   : > { %2354 = vmatprep.subr.bf16.mxu0 %v2485_v23 }
 0x20b   : > { %2355 = vmatpush3.bf16.msra.mxu0 %v2485_v23  ;;  %v2492_v23 = vld [vmem:[%s3209_s5 + $0x30] sm:$0xff]  }
 0x20c   : > { %2372 = vmatprep.subr.bf16.mxu0 %v2486_v24 }
 0x2c1   : > { %v2294_v30 = vpop.f32.mrb[16].mxu0 }
 0x2c2   : > { %v827_v31 = vadd.f32 %v2294_v30, %v2065_v29  ;;  %v818_v32 = vpop.f32.mrb[17].mxu0  ;;  %v2887_v30 = vld [vmem:[%s3208_s4 + $0x2] ss:$0 sm:$0xff] }
 0x2c3   : > { %v819_v33 = vadd.f32 %v2065_v29, %v818_v32  ;;  %v2295_v34 = vpop.f32.mrb[18].mxu0 }
 0x2c4   : > { %v830_v35 = vadd.f32 %v2295_v34, %v2065_v29  ;;  %v821_v36 = vpop.f32.mrb[19].mxu0  ;;  %v883_v38 = vmax.f32 %v827_v31, 0.0 }
 0x2c5   : > { %v822_v37 = vadd.f32 %v2065_v29, %v821_v36  ;;  %v881_v40 = vmax.f32 %v819_v33, 0.0 }
 0x2c6   : > { %v884_v39 = vmax.f32 %v830_v35, 0.0 }
 0x2c7   : > { %v882_v41 = vmax.f32 %v822_v37, 0.0 }
 0x2c8   : > { %v898_v42 = vpack.c.bf16 %v884_v39, %v883_v38 }
 0x2c9   : > { %v897_v43 = vpack.c.bf16 %v882_v41, %v881_v40  ;;  %v2298_v44 = vpop.f32.mrb[20].mxu0 }
 0x2ca   : > { %v843_v45 = vadd.f32 %v2298_v44, %v2065_v29  ;;  %v834_v46 = vpop.f32.mrb[21].mxu0 }
 0x2cb   : > { %v835_v47 = vadd.f32 %v2065_v29, %v834_v46  ;;  %v2299_v48 = vpop.f32.mrb[22].mxu0  ;;  %2324 = vmatprep.mubr.bf16.mxu1 %v897_v43 }
 0x2cc   : > { %v846_v49 = vadd.f32 %v2299_v48, %v2065_v29  ;;  %v837_v50 = vpop.f32.mrb[23].mxu0  ;;  %2325 = vmatmul.mubr.bf16.vlgmr.msra.gmra.mrb[16].mxu1 %v898_v42  ;;  %v887_v52 = vmax.f32 %v843_v45, 0.0 }
 0x2cd   : > { %v838_v51 = vadd.f32 %v2065_v29, %v837_v50  ;;  %v885_v54 = vmax.f32 %v835_v47, 0.0  ;;  %2412 = vmatpush3.bf16.msra.mxu1 %v2486_v24 }
 0x2ce   : > { %v888_v53 = vmax.f32 %v846_v49, 0.0  ;;  %2405 = vmatprep.subr.bf16.mxu1 %v2487_v25 }
 0x2cf   : > { %v886_v55 = vmax.f32 %v838_v51, 0.0 }
 0x2d0   : > { %v900_v56 = vpack.c.bf16 %v888_v53, %v887_v52 }
 0x2d1   : > { %v899_v57 = vpack.c.bf16 %v886_v55, %v885_v54  ;;  %v2302_v58 = vpop.f32.mrb[24].mxu0  ;;  %2413 = vmatpush3.bf16.msra.mxu1 %v2487_v25 }
 0x2d2   : > { %v859_v59 = vadd.f32 %v2302_v58, %v2065_v29  ;;  %v850_v60 = vpop.f32.mrb[25].mxu0  ;;  %2406 = vmatprep.subr.bf16.mxu1 %v2488_v26 }
 0x2d3   : > { %v851_v61 = vadd.f32 %v2065_v29, %v850_v60  ;;  %v2303_v62 = vpop.f32.mrb[26].mxu0  ;;  %2328 = vmatprep.mubr.bf16.mxu1 %v899_v57 }
 0x2d4   : > { %v862_v63 = vadd.f32 %v2303_v62, %v2065_v29  ;;  %v853_v0 = vpop.f32.mrb[27].mxu0  ;;  %2329 = vmatmul.mubr.bf16.gmra.mrb[20].mxu1 %v900_v56  ;;  %v891_v2 = vmax.f32 %v859_v59, 0.0 }
 0x2d5   : > { %v854_v1 = vadd.f32 %v2065_v29, %v853_v0  ;;  %v889_v4 = vmax.f32 %v851_v61, 0.0  ;;  %2414 = vmatpush3.bf16.msra.mxu1 %v2488_v26 }
 0x2d6   : > { %v892_v3 = vmax.f32 %v862_v63, 0.0  ;;  %2407 = vmatprep.subr.bf16.mxu1 %v2866_v27 }
 0x2d7   : > { %v890_v5 = vmax.f32 %v854_v1, 0.0 }
 0x2d8   : > { %v902_v6 = vpack.c.bf16 %v892_v3, %v891_v2 }
 0x2d9   : > { %v901_v7 = vpack.c.bf16 %v890_v5, %v889_v4  ;;  %v2306_v8 = vpop.f32.mrb[28].mxu0  ;;  %2415 = vmatpush3.bf16.msra.mxu1 %v2866_v27 }
 0x2da   : > { %v875_v9 = vadd.f32 %v2306_v8, %v2065_v29  ;;  %v866_v10 = vpop.f32.mrb[29].mxu0  ;;  %2408 = vmatprep.subr.bf16.mxu1 %v2872_v28 }
 0x2db   : > { %v867_v11 = vadd.f32 %v2065_v29, %v866_v10  ;;  %v2307_v12 = vpop.f32.mrb[30].mxu0  ;;  %2332 = vmatprep.mubr.bf16.mxu1 %v901_v7 }
 0x2dc   : > { %v878_v13 = vadd.f32 %v2307_v12, %v2065_v29  ;;  %v869_v14 = vpop.f32.mrb[31].mxu0  ;;  %2333 = vmatmul.mubr.bf16.gmra.mrb[24].mxu1 %v902_v6  ;;  %v895_v16 = vmax.f32 %v875_v9, 0.0 }
 0x2dd   : > { %v870_v15 = vadd.f32 %v2065_v29, %v869_v14  ;;  %v893_v18 = vmax.f32 %v867_v11, 0.0  ;;  %v2879_v29 = vld [vmem:[%s3209_s5 + $0x28] sm:$0xff]   ;;  %2416 = vmatpush3.bf16.msra.mxu1 %v2872_v28 }
 0x2de   : > { %v896_v17 = vmax.f32 %v878_v13, 0.0  ;;  %2409 = vmatprep.subr.bf16.mxu1 %v2879_v29 }
 0x2df   : > { %v894_v19 = vmax.f32 %v870_v15, 0.0 }
 0x2e0   : > { %v904_v20 = vpack.c.bf16 %v896_v17, %v895_v16 }
 0x2e1   : > { %v903_v21 = vpack.c.bf16 %v894_v19, %v893_v18  ;;  %2417 = vmatpush3.bf16.msra.mxu1 %v2879_v29 }
 0x2e2   : > { %2410 = vmatprep.subr.bf16.mxu1 %v2492_v23 }
 0x2e3   : > { %2336 = vmatprep.mubr.bf16.mxu1 %v903_v21 }
 0x2e4   : > { %2337 = vmatmul.mubr.bf16.gmra.mrb[28].mxu1 %v904_v20 }
 0x2e5   : > { %2418 = vmatpush3.bf16.msra.mxu1 %v2492_v23 }
 0x39f   : > { %v2326_v31 = vpop.f32.mrb[16].mxu1 }
 0x3a0   : > { %v1021_v32 = vadd.f32 %v2326_v31, %v2887_v30  ;;  %v1012_v33 = vpop.f32.mrb[17].mxu1 }
 0x3a1   : > { %v1013_v34 = vadd.f32 %v2887_v30, %v1012_v33  ;;  %v2327_v35 = vpop.f32.mrb[18].mxu1 }
 0x3a2   : > { %v1024_v36 = vadd.f32 %v2327_v35, %v2887_v30  ;;  %v1015_v37 = vpop.f32.mrb[19].mxu1  ;;  %v1077_v39 = vmax.f32 %v1021_v32, 0.0 }
 0x3a3   : > { %v1016_v38 = vadd.f32 %v2887_v30, %v1015_v37  ;;  %v1075_v41 = vmax.f32 %v1013_v34, 0.0 }
 0x3a4   : > { %v1078_v40 = vmax.f32 %v1024_v36, 0.0 }
 0x3a5   : > { %v1076_v42 = vmax.f32 %v1016_v38, 0.0 }
 0x3a6   : > { %v1092_v43 = vpack.c.bf16 %v1078_v40, %v1077_v39 }
 0x3a7   : > { %v1091_v44 = vpack.c.bf16 %v1076_v42, %v1075_v41  ;;  %v2330_v45 = vpop.f32.mrb[20].mxu1 }
 0x3a8   : > { %v1037_v46 = vadd.f32 %v2330_v45, %v2887_v30  ;;  %v1028_v47 = vpop.f32.mrb[21].mxu1 }
 0x3a9   : > { %v1029_v48 = vadd.f32 %v2887_v30, %v1028_v47  ;;  %v2331_v49 = vpop.f32.mrb[22].mxu1  ;;  %2356 = vmatprep.mubr.bf16.mxu0 %v1091_v44 }
 0x3aa   : > { %v1040_v50 = vadd.f32 %v2331_v49, %v2887_v30  ;;  %v1031_v51 = vpop.f32.mrb[23].mxu1  ;;  %2357 = vmatmul.mubr.bf16.vlgmr.msra.gmra.mrb[32].mxu0 %v1092_v43  ;;  %v1081_v53 = vmax.f32 %v1037_v46, 0.0 }
 0x3ab   : > { %v1032_v52 = vadd.f32 %v2887_v30, %v1031_v51  ;;  %2373 = vmatpush3.bf16.msra.mxu0 %v2486_v24  ;;  %v1079_v55 = vmax.f32 %v1029_v48, 0.0  ;;  %v2493_v24 = vld [vmem:[%s3209_s5 + $0x38] sm:$0xff]  }
 0x3ac   : > { %v1082_v54 = vmax.f32 %v1040_v50, 0.0  ;;  %2374 = vmatprep.subr.bf16.mxu0 %v2487_v25  ;;  %2411 = vmatprep.subr.bf16.mxu1 %v2493_v24 }
 0x3ad   : > { %v1080_v56 = vmax.f32 %v1032_v52, 0.0  ;;  %2419 = vmatpush3.bf16.msra.mxu1 %v2493_v24 }
 0x3ae   : > { %v1094_v57 = vpack.c.bf16 %v1082_v54, %v1081_v53 }
 0x3af   : > { %v1093_v58 = vpack.c.bf16 %v1080_v56, %v1079_v55  ;;  %v2334_v59 = vpop.f32.mrb[24].mxu1  ;;  %2375 = vmatpush3.bf16.msra.mxu0 %v2487_v25  ;;  %v2117_v25 = vld [vmem:[%s3208_s4 + $0x3] ss:$0 sm:$0xff] }
 0x3b0   : > { %v1053_v60 = vadd.f32 %v2334_v59, %v2887_v30  ;;  %v1044_v61 = vpop.f32.mrb[25].mxu1  ;;  %2376 = vmatprep.subr.bf16.mxu0 %v2488_v26 }
 0x3b1   : > { %v1045_v62 = vadd.f32 %v2887_v30, %v1044_v61  ;;  %v2335_v63 = vpop.f32.mrb[26].mxu1  ;;  %2360 = vmatprep.mubr.bf16.mxu0 %v1093_v58 }
 0x3b2   : > { %v1056_v0 = vadd.f32 %v2335_v63, %v2887_v30  ;;  %v1047_v1 = vpop.f32.mrb[27].mxu1  ;;  %2361 = vmatmul.mubr.bf16.gmra.mrb[36].mxu0 %v1094_v57  ;;  %v1085_v3 = vmax.f32 %v1053_v60, 0.0 }
 0x3b3   : > { %v1048_v2 = vadd.f32 %v2887_v30, %v1047_v1  ;;  %2377 = vmatpush3.bf16.msra.mxu0 %v2488_v26  ;;  %v1083_v5 = vmax.f32 %v1045_v62, 0.0 }
 0x3b4   : > { %v1086_v4 = vmax.f32 %v1056_v0, 0.0  ;;  %2378 = vmatprep.subr.bf16.mxu0 %v2866_v27 }
 0x3b5   : > { %v1084_v6 = vmax.f32 %v1048_v2, 0.0 }
 0x3b6   : > { %v1096_v7 = vpack.c.bf16 %v1086_v4, %v1085_v3 }
 0x3b7   : > { %v1095_v8 = vpack.c.bf16 %v1084_v6, %v1083_v5  ;;  %v2338_v9 = vpop.f32.mrb[28].mxu1  ;;  %2379 = vmatpush3.bf16.msra.mxu0 %v2866_v27 }
 0x3b8   : > { %v1069_v10 = vadd.f32 %v2338_v9, %v2887_v30  ;;  %v1060_v11 = vpop.f32.mrb[29].mxu1  ;;  %2380 = vmatprep.subr.bf16.mxu0 %v2872_v28 }
 0x3b9   : > { %v1061_v12 = vadd.f32 %v2887_v30, %v1060_v11  ;;  %v2339_v13 = vpop.f32.mrb[30].mxu1  ;;  %2364 = vmatprep.mubr.bf16.mxu0 %v1095_v8 }
 0x3ba   : > { %v1072_v14 = vadd.f32 %v2339_v13, %v2887_v30  ;;  %v1063_v15 = vpop.f32.mrb[31].mxu1  ;;  %2365 = vmatmul.mubr.bf16.gmra.mrb[40].mxu0 %v1096_v7  ;;  %v1089_v17 = vmax.f32 %v1069_v10, 0.0 }
 0x3bb   : > { %v1064_v16 = vadd.f32 %v2887_v30, %v1063_v15  ;;  %2381 = vmatpush3.bf16.msra.mxu0 %v2872_v28  ;;  %v1087_v19 = vmax.f32 %v1061_v12, 0.0 }
 0x3bc   : > { %v1090_v18 = vmax.f32 %v1072_v14, 0.0  ;;  %2382 = vmatprep.subr.bf16.mxu0 %v2879_v29 }
 0x3bd   : > { %v1088_v20 = vmax.f32 %v1064_v16, 0.0 }
 0x3be   : > { %v1098_v21 = vpack.c.bf16 %v1090_v18, %v1089_v17  ;;  %v2126_v18 = vld [vmem:[%s3210_s6] ss:$0 sm:$0xff] }
 0x3bf   : > { %v1097_v22 = vpack.c.bf16 %v1088_v20, %v1087_v19  ;;  %2383 = vmatpush3.bf16.msra.mxu0 %v2879_v29 }
 0x3c0   : > { %2384 = vmatprep.subr.bf16.mxu0 %v2492_v23 }
 0x3c1   : > { %2368 = vmatprep.mubr.bf16.mxu0 %v1097_v22 }
 0x3c2   : > { %2369 = vmatmul.mubr.bf16.gmra.mrb[44].mxu0 %v1098_v21 }
 0x3c3   : > { %2385 = vmatpush3.bf16.msra.mxu0 %v2492_v23 }
 0x3c4   : > { %2386 = vmatprep.subr.bf16.mxu0 %v2493_v24 }
 0x3c7   : > { %2387 = vmatpush3.bf16.msra.mxu0 %v2493_v24 }
 0x47d   : > { %v2358_v26 = vpop.f32.mrb[32].mxu0 }
 0x47e   : > { %v1215_v27 = vadd.f32 %v2358_v26, %v2117_v25  ;;  %v1206_v28 = vpop.f32.mrb[33].mxu0 }
 0x47f   : > { %v1207_v29 = vadd.f32 %v2117_v25, %v1206_v28  ;;  %v2359_v30 = vpop.f32.mrb[34].mxu0 }
 0x480   : > { %v1218_v31 = vadd.f32 %v2359_v30, %v2117_v25  ;;  %v1209_v32 = vpop.f32.mrb[35].mxu0  ;;  %v1271_v34 = vmax.f32 %v1215_v27, 0.0 }
 0x481   : > { %v1210_v33 = vadd.f32 %v2117_v25, %v1209_v32  ;;  %v1269_v36 = vmax.f32 %v1207_v29, 0.0 }
 0x482   : > { %v1272_v35 = vmax.f32 %v1218_v31, 0.0 }
 0x483   : > { %v1270_v37 = vmax.f32 %v1210_v33, 0.0 }
 0x484   : > { %v1286_v38 = vpack.c.bf16 %v1272_v35, %v1271_v34 }
 0x485   : > { %v1285_v39 = vpack.c.bf16 %v1270_v37, %v1269_v36  ;;  %v2362_v40 = vpop.f32.mrb[36].mxu0 }
 0x486   : > { %v1231_v41 = vadd.f32 %v2362_v40, %v2117_v25  ;;  %v1222_v42 = vpop.f32.mrb[37].mxu0 }
 0x487   : > { %v1223_v43 = vadd.f32 %v2117_v25, %v1222_v42  ;;  %v2363_v44 = vpop.f32.mrb[38].mxu0  ;;  %2388 = vmatprep.mubr.bf16.mxu0 %v1285_v39 }
 0x488   : > { %v1234_v45 = vadd.f32 %v2363_v44, %v2117_v25  ;;  %v1225_v46 = vpop.f32.mrb[39].mxu0  ;;  %2389 = vmatmul.mubr.bf16.vlgmr.msra.gmra.mrb[48].mxu0 %v1286_v38  ;;  %v1275_v48 = vmax.f32 %v1231_v41, 0.0 }
 0x489   : > { %v1226_v47 = vadd.f32 %v2117_v25, %v1225_v46  ;;  %v1273_v50 = vmax.f32 %v1223_v43, 0.0 }
 0x48a   : > { %v1276_v49 = vmax.f32 %v1234_v45, 0.0 }
 0x48b   : > { %v1274_v51 = vmax.f32 %v1226_v47, 0.0 }
 0x48c   : > { %v1288_v52 = vpack.c.bf16 %v1276_v49, %v1275_v48 }
 0x48d   : > { %v1287_v53 = vpack.c.bf16 %v1274_v51, %v1273_v50  ;;  %v2366_v54 = vpop.f32.mrb[40].mxu0 }
 0x48e   : > { %v1247_v55 = vadd.f32 %v2366_v54, %v2117_v25  ;;  %v1238_v56 = vpop.f32.mrb[41].mxu0 }
 0x48f   : > { %v1239_v57 = vadd.f32 %v2117_v25, %v1238_v56  ;;  %v2367_v58 = vpop.f32.mrb[42].mxu0  ;;  %2392 = vmatprep.mubr.bf16.mxu1 %v1287_v53 }
 0x490   : > { %v1250_v59 = vadd.f32 %v2367_v58, %v2117_v25  ;;  %v1241_v60 = vpop.f32.mrb[43].mxu0  ;;  %2393 = vmatmul.mubr.bf16.vlgmr.msra.gmra.mrb[32].mxu1 %v1288_v52  ;;  %v1279_v62 = vmax.f32 %v1247_v55, 0.0 }
 0x491   : > { %v1242_v61 = vadd.f32 %v2117_v25, %v1241_v60  ;;  %v1277_v0 = vmax.f32 %v1239_v57, 0.0 }
 0x492   : > { %v1280_v63 = vmax.f32 %v1250_v59, 0.0 }
 0x493   : > { %v1278_v1 = vmax.f32 %v1242_v61, 0.0 }
 0x494   : > { %v1290_v2 = vpack.c.bf16 %v1280_v63, %v1279_v62 }
 0x495   : > { %v1289_v3 = vpack.c.bf16 %v1278_v1, %v1277_v0  ;;  %v2370_v4 = vpop.f32.mrb[44].mxu0 }
 0x496   : > { %v1263_v5 = vadd.f32 %v2370_v4, %v2117_v25  ;;  %v1254_v6 = vpop.f32.mrb[45].mxu0 }
 0x497   : > { %v1255_v7 = vadd.f32 %v2117_v25, %v1254_v6  ;;  %v2371_v8 = vpop.f32.mrb[46].mxu0  ;;  %2396 = vmatprep.mubr.bf16.mxu1 %v1289_v3 }
 0x498   : > { %v1266_v9 = vadd.f32 %v2371_v8, %v2117_v25  ;;  %v1257_v10 = vpop.f32.mrb[47].mxu0  ;;  %2397 = vmatmul.mubr.bf16.gmra.mrb[36].mxu1 %v1290_v2  ;;  %v1283_v12 = vmax.f32 %v1263_v5, 0.0 }
 0x499   : > { %v1258_v11 = vadd.f32 %v2117_v25, %v1257_v10  ;;  %v1281_v14 = vmax.f32 %v1255_v7, 0.0 }
 0x49a   : > { %v1284_v13 = vmax.f32 %v1266_v9, 0.0 }
 0x49b   : > { %v1282_v15 = vmax.f32 %v1258_v11, 0.0 }
 0x49c   : > { %v1292_v16 = vpack.c.bf16 %v1284_v13, %v1283_v12 }
 0x49d   : > { %v1291_v17 = vpack.c.bf16 %v1282_v15, %v1281_v14 }
 0x49f   : > { %2400 = vmatprep.mubr.bf16.mxu1 %v1291_v17 }
 0x4a0   : > { %2401 = vmatmul.mubr.bf16.gmra.mrb[40].mxu1 %v1292_v16 }
 0x55b   : > { %v2390_v19 = vpop.f32.mrb[48].mxu0 }
 0x55c   : > { %v2923_v20 = vadd.f32 %v2390_v19, %v2126_v18  ;;  %v1398_v21 = vpop.f32.mrb[49].mxu0 }
 0x55d   : > { %v2925_v22 = vadd.f32 %v2126_v18, %v1398_v21  ;;  %v2391_v23 = vpop.f32.mrb[50].mxu0 }
 0x55e   : > { %1481 = vrot.lane.b32.xlu1 %v2923_v20, %s2632_s10  ;;  %v1401_v24 = vpop.f32.mrb[51].mxu0  ;;  %v2931_v25 = vadd.f32 %v2391_v23, %v2126_v18 }
 0x55f   : > { %1477 = vrot.lane.b32.xlu0 %v2925_v22, %s2632_s10  ;;  %v2933_v26 = vadd.f32 %v2126_v18, %v1401_v24 }
 0x562   : > { %1483 = vrot.lane.b32.xlu1 %v2931_v25, %s2632_s10 }
 0x563   : > { %v2394_v27 = vpop.f32.mrb[32].mxu1  ;;  %1479 = vrot.lane.b32.xlu0 %v2933_v26, %s2632_s10 }
 0x564   : > { %v2939_v28 = vadd.f32 %v2394_v27, %v2126_v18  ;;  %v1414_v29 = vpop.f32.mrb[33].mxu1 }
 0x565   : > { %v2395_v30 = vpop.f32.mrb[34].mxu1  ;;  %v2947_v33 = vadd.f32 %v2126_v18, %v1414_v29 }
 0x566   : > { %v2941_v31 = vadd.f32 %v2395_v30, %v2126_v18  ;;  %v1417_v32 = vpop.f32.mrb[35].mxu1 }
 0x567   : > { %1489 = vrot.lane.b32.xlu0 %v2939_v28, %s2632_s10  ;;  %v2949_v34 = vadd.f32 %v2126_v18, %v1417_v32 }
 0x568   : > { %1491 = vrot.lane.b32.xlu1 %v2941_v31, %s2632_s10 }
 0x56b   : > { %v2398_v35 = vpop.f32.mrb[36].mxu1  ;;  %1485 = vrot.lane.b32.xlu0 %v2947_v33, %s2632_s10 }
 0x56c   : > { %v2953_v36 = vadd.f32 %v2398_v35, %v2126_v18  ;;  %v1430_v37 = vpop.f32.mrb[37].mxu1  ;;  %1487 = vrot.lane.b32.xlu1 %v2949_v34, %s2632_s10 }
 0x56d   : > { %v2399_v38 = vpop.f32.mrb[38].mxu1  ;;  %v2963_v41 = vadd.f32 %v2126_v18, %v1430_v37 }
 0x56e   : > { %v2957_v39 = vadd.f32 %v2399_v38, %v2126_v18  ;;  %v1433_v40 = vpop.f32.mrb[39].mxu1 }
 0x56f   : > { %1497 = vrot.lane.b32.xlu0 %v2953_v36, %s2632_s10  ;;  %v2965_v42 = vadd.f32 %v2126_v18, %v1433_v40 }
 0x570   : > { %1499 = vrot.lane.b32.xlu1 %v2957_v39, %s2632_s10 }
 0x573   : > { %v2402_v43 = vpop.f32.mrb[40].mxu1  ;;  %1493 = vrot.lane.b32.xlu0 %v2963_v41, %s2632_s10 }
 0x574   : > { %v1446_v44 = vpop.f32.mrb[41].mxu1  ;;  %1495 = vrot.lane.b32.xlu1 %v2965_v42, %s2632_s10  ;;  %v2977_v49 = vadd.f32 %v2402_v43, %v2126_v18 }
 0x575   : > { %v2971_v45 = vadd.f32 %v2126_v18, %v1446_v44  ;;  %v2403_v46 = vpop.f32.mrb[42].mxu1 }
 0x576   : > { %v1449_v47 = vpop.f32.mrb[43].mxu1  ;;  %v2981_v50 = vadd.f32 %v2403_v46, %v2126_v18 }
 0x577   : > { %v2973_v48 = vadd.f32 %v2126_v18, %v1449_v47  ;;  %1501 = vrot.lane.b32.xlu0 %v2971_v45, %s2632_s10 }
 0x579   : > { %1503 = vrot.lane.b32.xlu1 %v2973_v48, %s2632_s10 }
 0x57b   : > { %1505 = vrot.lane.b32.xlu0 %v2977_v49, %s2632_s10 }
 0x57d   : > { %1507 = vrot.lane.b32.xlu1 %v2981_v50, %s2632_s10 }
 0x5d0   : > { %v1482_v51 = vpop.permute.xlu1 %1481 }
 0x5d1   : > { %v2988_v52 = vmax.f32 %v2923_v20, %v1482_v51  ;;  %v1478_v53 = vpop.permute.xlu0 %1477 }
 0x5d2   : > { %v2993_v55 = vmax.f32 %v2925_v22, %v1478_v53 }
 0x5d3   : > { %1609 = vrot.lane.b32.xlu0 %v2988_v52, %s2633_s11 }
 0x5d4   : > { %v1484_v54 = vpop.permute.xlu1 %1483 }
 0x5d5   : > { %v2996_v56 = vmax.f32 %v2931_v25, %v1484_v54  ;;  %v1480_v57 = vpop.permute.xlu0 %1479 }
 0x5d6   : > { %v3003_v58 = vmax.f32 %v2933_v26, %v1480_v57 }
 0x5d7   : > { %1611 = vrot.lane.b32.xlu1 %v2996_v56, %s2633_s11  ;;  %1605 = vrot.lane.b32.xlu0 %v2993_v55, %s2633_s11 }
 0x5d9   : > { %v1490_v59 = vpop.permute.xlu0 %1489 }
 0x5da   : > { %v3006_v60 = vmax.f32 %v2939_v28, %v1490_v59  ;;  %v1492_v61 = vpop.permute.xlu1 %1491 }
 0x5db   : > { %1607 = vrot.lane.b32.xlu1 %v3003_v58, %s2633_s11  ;;  %v3013_v62 = vmax.f32 %v2941_v31, %v1492_v61 }
 0x5dc   : > { %1617 = vrot.lane.b32.xlu0 %v3006_v60, %s2633_s11 }
 0x5dd   : > { %v1486_v63 = vpop.permute.xlu0 %1485 }
 0x5de   : > { %v3016_v0 = vmax.f32 %v2947_v33, %v1486_v63  ;;  %v1488_v1 = vpop.permute.xlu1 %1487 }
 0x5df   : > { %1619 = vrot.lane.b32.xlu1 %v3013_v62, %s2633_s11  ;;  %v3023_v2 = vmax.f32 %v2949_v34, %v1488_v1 }
 0x5e0   : > { %1613 = vrot.lane.b32.xlu0 %v3016_v0, %s2633_s11 }
 0x5e1   : > { %v1498_v3 = vpop.permute.xlu0 %1497 }
 0x5e2   : > { %v3026_v4 = vmax.f32 %v2953_v36, %v1498_v3  ;;  %v1500_v5 = vpop.permute.xlu1 %1499 }
 0x5e3   : > { %1615 = vrot.lane.b32.xlu1 %v3023_v2, %s2633_s11  ;;  %v3033_v6 = vmax.f32 %v2957_v39, %v1500_v5 }
 0x5e4   : > { %1625 = vrot.lane.b32.xlu0 %v3026_v4, %s2633_s11 }
 0x5e5   : > { %v1494_v7 = vpop.permute.xlu0 %1493 }
 0x5e6   : > { %v3036_v8 = vmax.f32 %v2963_v41, %v1494_v7  ;;  %v1496_v9 = vpop.permute.xlu1 %1495 }
 0x5e7   : > { %1627 = vrot.lane.b32.xlu1 %v3033_v6, %s2633_s11  ;;  %v3043_v10 = vmax.f32 %v2965_v42, %v1496_v9 }
 0x5e8   : > { %1621 = vrot.lane.b32.xlu0 %v3036_v8, %s2633_s11 }
 0x5e9   : > { %v1502_v11 = vpop.permute.xlu0 %1501 }
 0x5ea   : > { %v3046_v12 = vmax.f32 %v2971_v45, %v1502_v11 }
 0x5eb   : > { %v1504_v13 = vpop.permute.xlu1 %1503  ;;  %1623 = vrot.lane.b32.xlu1 %v3043_v10, %s2633_s11 }
 0x5ec   : > { %v3051_v14 = vmax.f32 %v2973_v48, %v1504_v13  ;;  %1629 = vrot.lane.b32.xlu0 %v3046_v12, %s2633_s11 }
 0x5ed   : > { %v1506_v15 = vpop.permute.xlu0 %1505 }
 0x5ee   : > { %v3056_v16 = vmax.f32 %v2977_v49, %v1506_v15 }
 0x5ef   : > { %v1508_v17 = vpop.permute.xlu1 %1507  ;;  %1631 = vrot.lane.b32.xlu1 %v3051_v14, %s2633_s11 }
 0x5f0   : > { %v3061_v18 = vmax.f32 %v2981_v50, %v1508_v17  ;;  %1633 = vrot.lane.b32.xlu0 %v3056_v16, %s2633_s11  ;;  %v2634_v17 = vmov 0  }
 0x5f1   : > { %2444 = vset.pattern.permute.xlu0 %v2634_v17  ;;  %2443 = vset.pattern.permute.xlu1 %v2634_v17 }
 0x5f3   : > { %1635 = vrot.lane.b32.xlu1 %v3061_v18, %s2633_s11 }
 0x645   : > { %v1610_v19 = vpop.permute.xlu0 %1609 }
 0x646   : > { %v1655_v21 = vsub.f32 %v2923_v20, %v1610_v19 }
 0x648   : > { %v1673_v23 = vmul.f32 1.442695, %v1655_v21 }
 0x649   : > { %v1612_v24 = vpop.permute.xlu1 %1611  ;;  %v1606_v27 = vpop.permute.xlu0 %1605 }
 0x64a   : > { %2494 = vpow2.f32 %v1673_v23  ;;  %v1656_v29 = vsub.f32 %v2931_v25, %v1612_v24  ;;  %v1653_v30 = vsub.f32 %v2925_v22, %v1606_v27 }
 0x64c   : > { %v1675_v32 = vmul.f32 1.442695, %v1656_v29  ;;  %v1669_v35 = vmul.f32 1.442695, %v1653_v30 }
 0x64d   : > { %v1608_v37 = vpop.permute.xlu1 %1607 }
 0x64e   : > { %2496 = vpow2.f32 %v1675_v32  ;;  %v1654_v38 = vsub.f32 %v2933_v26, %v1608_v37  ;;  %v1618_v40 = vpop.permute.xlu0 %1617 }
 0x64f   : > { %2498 = vpow2.f32 %v1669_v35  ;;  %v1659_v43 = vsub.f32 %v2939_v28, %v1618_v40 }
 0x650   : > { %v1671_v44 = vmul.f32 1.442695, %v1654_v38 }
 0x651   : > { %v1681_v46 = vmul.f32 1.442695, %v1659_v43  ;;  %v1620_v47 = vpop.permute.xlu1 %1619 }
 0x652   : > { %2500 = vpow2.f32 %v1671_v44  ;;  %v1660_v51 = vsub.f32 %v2941_v31, %v1620_v47  ;;  %v1614_v53 = vpop.permute.xlu0 %1613 }
 0x653   : > { %2502 = vpow2.f32 %v1681_v46  ;;  %v1657_v54 = vsub.f32 %v2947_v33, %v1614_v53 }
 0x654   : > { %v2495_v57 = vpop.eup %2494  ;;  %v1683_v59 = vmul.f32 1.442695, %v1660_v51 }
 0x655   : > { %v1677_v61 = vmul.f32 1.442695, %v1657_v54  ;;  %v1616_v63 = vpop.permute.xlu1 %1615  ;;  %1721 = vrot.lane.b32.xlu0 %v2495_v57, %s2632_s10 }
 0x656   : > { %2504 = vpow2.f32 %v1683_v59  ;;  %v1658_v1 = vsub.f32 %v2949_v34, %v1616_v63  ;;  %v1626_v3 = vpop.permute.xlu0 %1625 }
 0x657   : > { %2506 = vpow2.f32 %v1677_v61  ;;  %v1663_v5 = vsub.f32 %v2953_v36, %v1626_v3 }
 0x658   : > { %v2497_v7 = vpop.eup %2496  ;;  %v1679_v9 = vmul.f32 1.442695, %v1658_v1 }
 0x659   : > { %v2499_v11 = vpop.eup %2498  ;;  %v1689_v13 = vmul.f32 1.442695, %v1663_v5  ;;  %1723 = vrot.lane.b32.xlu1 %v2497_v7, %s2632_s10  ;;  %v1628_v15 = vpop.permute.xlu1 %1627 }
 0x65a   : > { %2508 = vpow2.f32 %v1679_v9  ;;  %v1664_v19 = vsub.f32 %v2957_v39, %v1628_v15  ;;  %1717 = vrot.lane.b32.xlu0 %v2499_v11, %s2632_s10  ;;  %v1622_v21 = vpop.permute.xlu0 %1621 }
 0x65b   : > { %2510 = vpow2.f32 %v1689_v13  ;;  %v1661_v23 = vsub.f32 %v2963_v41, %v1622_v21  ;;  %v1543_v21 = vsub.f32 %v2923_v20, %v2988_v52 }
 0x65c   : > { %v2501_v24 = vpop.eup %2500  ;;  %v1691_v27 = vmul.f32 1.442695, %v1664_v19 }
 0x65d   : > { %v2503_v29 = vpop.eup %2502  ;;  %v1685_v30 = vmul.f32 1.442695, %v1661_v23  ;;  %1719 = vrot.lane.b32.xlu1 %v2501_v24, %s2632_s10  ;;  %v1624_v32 = vpop.permute.xlu1 %1623  ;;  %v1561_v23 = vmul.f32 1.442695, %v1543_v21  ;;  %v1544_v24 = vsub.f32 %v2931_v25, %v2996_v56 }
 0x65e   : > { %2512 = vpow2.f32 %v1691_v27  ;;  %v1662_v35 = vsub.f32 %v2965_v42, %v1624_v32  ;;  %1729 = vrot.lane.b32.xlu0 %v2503_v29, %s2632_s10  ;;  %v1630_v37 = vpop.permute.xlu0 %1629  ;;  %v1541_v27 = vsub.f32 %v2925_v22, %v2993_v55 }
 0x65f   : > { %2514 = vpow2.f32 %v1685_v30  ;;  %v1665_v38 = vsub.f32 %v2971_v45, %v1630_v37  ;;  %v1563_v29 = vmul.f32 1.442695, %v1544_v24  ;;  %v1542_v30 = vsub.f32 %v2933_v26, %v3003_v58 }
 0x660   : > { %v2505_v40 = vpop.eup %2504  ;;  %v1687_v43 = vmul.f32 1.442695, %v1662_v35  ;;  %v1557_v32 = vmul.f32 1.442695, %v1541_v27  ;;  %v1547_v35 = vsub.f32 %v2939_v28, %v3006_v60  ;;  %v1548_v37 = vsub.f32 %v2941_v31, %v3013_v62 }
 0x661   : > { %v2507_v44 = vpop.eup %2506  ;;  %v1693_v46 = vmul.f32 1.442695, %v1665_v38  ;;  %1731 = vrot.lane.b32.xlu1 %v2505_v40, %s2632_s10  ;;  %v1632_v47 = vpop.permute.xlu1 %1631  ;;  %v1559_v38 = vmul.f32 1.442695, %v1542_v30  ;;  %v1545_v40 = vsub.f32 %v2947_v33, %v3016_v0 }
 0x662   : > { %2516 = vpow2.f32 %v1687_v43  ;;  %v1666_v51 = vsub.f32 %v2973_v48, %v1632_v47  ;;  %1725 = vrot.lane.b32.xlu0 %v2507_v44, %s2632_s10  ;;  %v1634_v53 = vpop.permute.xlu0 %1633  ;;  %v1569_v43 = vmul.f32 1.442695, %v1547_v35  ;;  %v1546_v44 = vsub.f32 %v2949_v34, %v3023_v2 }
 0x663   : > { %2518 = vpow2.f32 %v1693_v46  ;;  %v1667_v54 = vsub.f32 %v2977_v49, %v1634_v53  ;;  %v1571_v46 = vmul.f32 1.442695, %v1548_v37  ;;  %v1551_v47 = vsub.f32 %v2953_v36, %v3026_v4 }
 0x664   : > { %v2509_v57 = vpop.eup %2508  ;;  %v1695_v59 = vmul.f32 1.442695, %v1666_v51  ;;  %v1565_v51 = vmul.f32 1.442695, %v1545_v40  ;;  %v1552_v53 = vsub.f32 %v2957_v39, %v3033_v6 }
 0x665   : > { %v2511_v61 = vpop.eup %2510  ;;  %v1697_v63 = vmul.f32 1.442695, %v1667_v54  ;;  %1727 = vrot.lane.b32.xlu1 %v2509_v57, %s2632_s10  ;;  %v1636_v1 = vpop.permute.xlu1 %1635  ;;  %v1567_v57 = vmul.f32 1.442695, %v1546_v44 }
 0x666   : > { %2520 = vpow2.f32 %v1695_v59  ;;  %v1668_v3 = vsub.f32 %v2981_v50, %v1636_v1  ;;  %1737 = vrot.lane.b32.xlu0 %v2511_v61, %s2632_s10  ;;  %v1577_v61 = vmul.f32 1.442695, %v1551_v47 }
 0x667   : > { %2522 = vpow2.f32 %v1697_v63  ;;  %v1549_v63 = vsub.f32 %v2963_v41, %v3036_v8 }
 0x668   : > { %v2513_v5 = vpop.eup %2512  ;;  %v1699_v7 = vmul.f32 1.442695, %v1668_v3  ;;  %v1579_v3 = vmul.f32 1.442695, %v1552_v53 }
 0x669   : > { %v2515_v9 = vpop.eup %2514  ;;  %1739 = vrot.lane.b32.xlu1 %v2513_v5, %s2632_s10  ;;  %v1550_v5 = vsub.f32 %v2965_v42, %v3043_v10 }
 0x66a   : > { %2524 = vpow2.f32 %v1699_v7  ;;  %1733 = vrot.lane.b32.xlu0 %v2515_v9, %s2632_s10 }
 0x66b   : > { %2526 = vpow2.f32 %v1561_v23  ;;  %v1575_v21 = vmul.f32 1.442695, %v1550_v5 }
 0x66c   : > { %v2517_v11 = vpop.eup %2516  ;;  %2528 = vpow2.f32 %v1563_v29 }
 0x66d   : > { %v2519_v13 = vpop.eup %2518  ;;  %1735 = vrot.lane.b32.xlu1 %v2517_v11, %s2632_s10  ;;  %2530 = vpow2.f32 %v1557_v32  ;;  %v1554_v32 = vsub.f32 %v2973_v48, %v3051_v14 }
 0x66e   : > { %1741 = vrot.lane.b32.xlu0 %v2519_v13, %s2632_s10  ;;  %2532 = vpow2.f32 %v1559_v38  ;;  %v1573_v13 = vmul.f32 1.442695, %v1549_v63  ;;  %v1555_v38 = vsub.f32 %v2977_v49, %v3056_v16 }
 0x66f   : > { %2534 = vpow2.f32 %v1569_v43 }
 0x670   : > { %v2521_v15 = vpop.eup %2520  ;;  %2536 = vpow2.f32 %v1571_v46 }
 0x671   : > { %v2523_v17 = vpop.eup %2522  ;;  %1743 = vrot.lane.b32.xlu1 %v2521_v15, %s2632_s10  ;;  %2538 = vpow2.f32 %v1565_v51  ;;  %v1553_v15 = vsub.f32 %v2971_v45, %v3046_v12  ;;  %v1583_v51 = vmul.f32 1.442695, %v1554_v32 }
 0x672   : > { %1745 = vrot.lane.b32.xlu0 %v2523_v17, %s2632_s10 }
 0x673   : > { %v1581_v30 = vmul.f32 1.442695, %v1553_v15 }
 0x674   : > { %v2525_v19 = vpop.eup %2524 }
 0x675   : > { %1747 = vrot.lane.b32.xlu1 %v2525_v19, %s2632_s10  ;;  %v2527_v54 = vpop.eup %2526 }
 0x676   : > { %v2529_v7 = vpop.eup %2528 }
 0x677   : > { %v2531_v11 = vpop.eup %2530 }
 0x678   : > { %v2533_v24 = vpop.eup %2532 }
 0x679   : > { %v2535_v29 = vpop.eup %2534 }
 0x67a   : > { %v2537_v43 = vpop.eup %2536 }
 0x67b   : > { %v2539_v44 = vpop.eup %2538 }
 0x6c7   : > { %v1722_v59 = vpop.permute.xlu0 %1721 }
 0x6c8   : > { %v1767_v1 = vadd.f32 %v2527_v54, %v1722_v59  ;;  %v1585_v59 = vmul.f32 1.442695, %v1555_v38 }
 0x6ca   : > { %2540 = vlog2.f32 %v1767_v1 }
 0x6cb   : > { %2542 = vpow2.f32 %v1567_v57  ;;  %v1724_v9 = vpop.permute.xlu1 %1723 }
 0x6cc   : > { %2544 = vpow2.f32 %v1577_v61  ;;  %v1768_v17 = vadd.f32 %v2529_v7, %v1724_v9  ;;  %v1718_v19 = vpop.permute.xlu0 %1717  ;;  %v1556_v61 = vsub.f32 %v2981_v50, %v3061_v18 }
 0x6cd   : > { %2546 = vpow2.f32 %v1579_v3  ;;  %v1765_v23 = vadd.f32 %v2531_v11, %v1718_v19 }
 0x6ce   : > { %2548 = vlog2.f32 %v1768_v17  ;;  %v1587_v19 = vmul.f32 1.442695, %v1556_v61 }
 0x6cf   : > { %2550 = vlog2.f32 %v1765_v23  ;;  %v1720_v27 = vpop.permute.xlu1 %1719 }
 0x6d0   : > { %2552 = vpow2.f32 %v1573_v13  ;;  %v1766_v35 = vadd.f32 %v2533_v24, %v1720_v27  ;;  %v1730_v37 = vpop.permute.xlu0 %1729 }
 0x6d1   : > { %2554 = vpow2.f32 %v1575_v21  ;;  %v1771_v40 = vadd.f32 %v2535_v29, %v1730_v37 }
 0x6d2   : > { %2556 = vlog2.f32 %v1766_v35 }
 0x6d3   : > { %2558 = vlog2.f32 %v1771_v40  ;;  %v1732_v46 = vpop.permute.xlu1 %1731 }
 0x6d4   : > { %v2541_v47 = vpop.eup %2540  ;;  %2560 = vpow2.f32 %v1581_v30  ;;  %v1772_v53 = vadd.f32 %v2537_v43, %v1732_v46  ;;  %v1726_v54 = vpop.permute.xlu0 %1725 }
 0x6d5   : > { %v2543_v57 = vpop.eup %2542  ;;  %v1786_v63 = vmul.f32 0.6931472, %v2541_v47  ;;  %v1769_v1 = vadd.f32 %v2539_v44, %v1726_v54 }
 0x6d6   : > { %v2545_v3 = vpop.eup %2544  ;;  %2562 = vlog2.f32 %v1772_v53 }
 0x6d7   : > { %v2547_v5 = vpop.eup %2546  ;;  %2564 = vlog2.f32 %v1769_v1  ;;  %v1728_v7 = vpop.permute.xlu1 %1727  ;;  %v1815_v9 = vadd.f32 %v1786_v63, %v2988_v52 }
 0x6d8   : > { %v2549_v11 = vpop.eup %2548  ;;  %2566 = vpow2.f32 %v1583_v51  ;;  %v1770_v13 = vadd.f32 %v2543_v57, %v1728_v7  ;;  %v1738_v15 = vpop.permute.xlu0 %1737 }
 0x6d9   : > { %v2551_v17 = vpop.eup %2550  ;;  %2568 = vpow2.f32 %v1585_v59  ;;  %v1775_v21 = vadd.f32 %v2545_v3, %v1738_v15  ;;  %1841 = vperm.xlu1 %2443, %v1815_v9   ;;  %v1788_v32 = vmul.f32 0.6931472, %v2549_v11 }
 0x6da   : > { %v2553_v23 = vpop.eup %2552  ;;  %v1782_v24 = vmul.f32 0.6931472, %v2551_v17  ;;  %2570 = vlog2.f32 %v1770_v13 }
 0x6db   : > { %v2555_v27 = vpop.eup %2554  ;;  %2572 = vlog2.f32 %v1775_v21  ;;  %v1740_v29 = vpop.permute.xlu1 %1739  ;;  %v1816_v59 = vadd.f32 %v1788_v32, %v2996_v56 }
 0x6dc   : > { %v2557_v30 = vpop.eup %2556  ;;  %v1776_v35 = vadd.f32 %v2547_v5, %v1740_v29  ;;  %v1734_v37 = vpop.permute.xlu0 %1733  ;;  %v1813_v52 = vadd.f32 %v1782_v24, %v2993_v55  ;;  %2574 = vpow2.f32 %v1587_v19 }
 0x6dd   : > { %v2559_v38 = vpop.eup %2558  ;;  %v1784_v40 = vmul.f32 0.6931472, %v2557_v30  ;;  %v1773_v43 = vadd.f32 %v2553_v23, %v1734_v37 }
 0x6de   : > { %v2561_v44 = vpop.eup %2560  ;;  %2576 = vlog2.f32 %v1776_v35  ;;  %1831 = vperm.xlu0 %2444, %v1813_v52   ;;  %v1794_v46 = vmul.f32 0.6931472, %v2559_v38 }
 0x6df   : > { %2578 = vlog2.f32 %v1773_v43  ;;  %v1736_v47 = vpop.permute.xlu1 %1735  ;;  %v1814_v51 = vadd.f32 %v1784_v40, %v3003_v58 }
 0x6e0   : > { %v2563_v53 = vpop.eup %2562  ;;  %v1774_v54 = vadd.f32 %v2555_v27, %v1736_v47  ;;  %v1742_v57 = vpop.permute.xlu0 %1741  ;;  %v1819_v58 = vadd.f32 %v1794_v46, %v3006_v60 }
 0x6e1   : > { %v2565_v61 = vpop.eup %2564  ;;  %v1796_v63 = vmul.f32 0.6931472, %v2563_v53  ;;  %v1777_v55 = vadd.f32 %v2561_v44, %v1742_v57  ;;  %1836 = vperm.xlu1 %2443, %v1814_v51  }
 0x6e2   : > { %v2567_v1 = vpop.eup %2566  ;;  %2580 = vlog2.f32 %v1774_v54  ;;  %1846 = vperm.xlu0 %2444, %v1816_v59   ;;  %v1790_v5 = vmul.f32 0.6931472, %v2565_v61 }
 0x6e3   : > { %v2569_v3 = vpop.eup %2568  ;;  %2582 = vlog2.f32 %v1777_v55  ;;  %v1744_v7 = vpop.permute.xlu1 %1743  ;;  %v1820_v9 = vadd.f32 %v1796_v63, %v3013_v62 }
 0x6e4   : > { %v2571_v11 = vpop.eup %2570  ;;  %v1778_v13 = vadd.f32 %v2567_v1, %v1744_v7  ;;  %v1746_v15 = vpop.permute.xlu0 %1745  ;;  %v1817_v29 = vadd.f32 %v1790_v5, %v3016_v0 }
 0x6e5   : > { %v2573_v17 = vpop.eup %2572  ;;  %v1792_v56 = vmul.f32 0.6931472, %v2571_v11  ;;  %v1779_v19 = vadd.f32 %v2569_v3, %v1746_v15  ;;  %1861 = vperm.xlu1 %2443, %v1819_v58  }
 0x6e6   : > { %2584 = vlog2.f32 %v1778_v13  ;;  %1866 = vperm.xlu0 %2444, %v1820_v9   ;;  %v2575_v21 = vpop.eup %2574  ;;  %v1802_v23 = vmul.f32 0.6931472, %v2573_v17 }
 0x6e7   : > { %2586 = vlog2.f32 %v1779_v19  ;;  %v1748_v24 = vpop.permute.xlu1 %1747  ;;  %v1818_v27 = vadd.f32 %v1792_v56, %v3023_v2 }
 0x6e8   : > { %v2577_v62 = vpop.eup %2576  ;;  %v1780_v30 = vadd.f32 %v2575_v21, %v1748_v24  ;;  %v1823_v52 = vadd.f32 %v1802_v23, %v3026_v4 }
 0x6e9   : > { %v2579_v60 = vpop.eup %2578  ;;  %v1804_v32 = vmul.f32 0.6931472, %v2577_v62  ;;  %1851 = vperm.xlu1 %2443, %v1817_v29  }
 0x6ea   : > { %2588 = vlog2.f32 %v1780_v30  ;;  %1856 = vperm.xlu0 %2444, %v1818_v27   ;;  %v1798_v35 = vmul.f32 0.6931472, %v2579_v60 }
 0x6eb   : > { %v1824_v37 = vadd.f32 %v1804_v32, %v3033_v6 }
 0x6ec   : > { %v2581_v38 = vpop.eup %2580  ;;  %v1821_v44 = vadd.f32 %v1798_v35, %v3036_v8 }
 0x6ed   : > { %v2583_v40 = vpop.eup %2582  ;;  %v1800_v43 = vmul.f32 0.6931472, %v2581_v38  ;;  %1881 = vperm.xlu1 %2443, %v1823_v52  }
 0x6ee   : > { %1886 = vperm.xlu0 %2444, %v1824_v37   ;;  %v1806_v2 = vmul.f32 0.6931472, %v2583_v40 }
 0x6ef   : > { %v1822_v0 = vadd.f32 %v1800_v43, %v3043_v10 }
 0x6f0   : > { %v2585_v46 = vpop.eup %2584  ;;  %v1825_v4 = vadd.f32 %v1806_v2, %v3046_v12 }
 0x6f1   : > { %v2587_v47 = vpop.eup %2586  ;;  %v1808_v51 = vmul.f32 0.6931472, %v2585_v46  ;;  %1871 = vperm.xlu1 %2443, %v1821_v44  }
 0x6f2   : > { %1876 = vperm.xlu0 %2444, %v1822_v0   ;;  %v1810_v53 = vmul.f32 0.6931472, %v2587_v47 }
 0x6f3   : > { %v1826_v6 = vadd.f32 %v1808_v51, %v3051_v14 }
 0x6f4   : > { %v2589_v54 = vpop.eup %2588  ;;  %v1827_v10 = vadd.f32 %v1810_v53, %v3056_v16 }
 0x6f5   : > { %v1812_v57 = vmul.f32 0.6931472, %v2589_v54  ;;  %1891 = vperm.xlu1 %2443, %v1825_v4  }
 0x6f6   : > { %1896 = vperm.xlu0 %2444, %v1826_v6  }
 0x6f7   : > { %v1828_v59 = vadd.f32 %v1812_v57, %v3061_v18 }
 0x6f9   : > { %1901 = vperm.xlu1 %2443, %v1827_v10  }
 0x6fa   : > { %1906 = vperm.xlu0 %2444, %v1828_v59  }
 0x758   : > { %v1842_v8 = vpop.permute.xlu1 %1841 }
 0x759   : > { %v1911_v12 = vsub.f32 %v2923_v20, %v1842_v8 }
 0x75b   : > { %1928 = vst.msk [vmem:[%s3151_s15 + $0x10] sm:$0xff] %vm1925_vm3, %v1911_v12 }
 0x75d   : > { %v1832_v14 = vpop.permute.xlu0 %1831 }
 0x75e   : > { %v1909_v16 = vsub.f32 %v2925_v22, %v1832_v14 }
 0x760   : > { %1926 = vst.msk [vmem:[%s3151_s15] sm:$0xff] %vm1925_vm3, %v1909_v16  ;;  %v1837_v18 = vpop.permute.xlu1 %1836 }
 0x761   : > { %v1910_v61 = vsub.f32 %v2933_v26, %v1837_v18  ;;  %v1847_v63 = vpop.permute.xlu0 %1846 }
 0x762   : > { %v1912_v55 = vsub.f32 %v2931_v25, %v1847_v63 }
 0x763   : > { %1927 = vst.msk [vmem:[%s3151_s15 + $0x8] sm:$0xff] %vm1925_vm3, %v1910_v61 }
 0x764   : > { %1929 = vst.msk [vmem:[%s3151_s15 + $0x18] sm:$0xff] %vm1925_vm3, %v1912_v55  ;;  %v1862_v20 = vpop.permute.xlu1 %1861 }
 0x765   : > { %v1915_v1 = vsub.f32 %v2939_v28, %v1862_v20  ;;  %v1867_v22 = vpop.permute.xlu0 %1866 }
 0x766   : > { %v1916_v3 = vsub.f32 %v2941_v31, %v1867_v22 }
 0x767   : > { %1932 = vst.msk [vmem:[%s3151_s15 + $0x30] sm:$0xff] %vm1925_vm3, %v1915_v1 }
 0x768   : > { %1933 = vst.msk [vmem:[%s3151_s15 + $0x38] sm:$0xff] %vm1925_vm3, %v1916_v3  ;;  %v1852_v26 = vpop.permute.xlu1 %1851 }
 0x769   : > { %v1913_v25 = vsub.f32 %v2947_v33, %v1852_v26  ;;  %v1857_v5 = vpop.permute.xlu0 %1856 }
 0x76a   : > { %v1914_v7 = vsub.f32 %v2949_v34, %v1857_v5 }
 0x76b   : > { %1930 = vst.msk [vmem:[%s3151_s15 + $0x20] sm:$0xff] %vm1925_vm3, %v1913_v25 }
 0x76c   : > { %1931 = vst.msk [vmem:[%s3151_s15 + $0x28] sm:$0xff] %vm1925_vm3, %v1914_v7  ;;  %v1882_v28 = vpop.permute.xlu1 %1881 }
 0x76d   : > { %v1919_v31 = vsub.f32 %v2953_v36, %v1882_v28  ;;  %v1887_v9 = vpop.permute.xlu0 %1886 }
 0x76e   : > { %v1920_v58 = vsub.f32 %v2957_v39, %v1887_v9 }
 0x76f   : > { %1936 = vst.msk [vmem:[%s3151_s15 + $0x50] sm:$0xff] %vm1925_vm3, %v1919_v31 }
 0x770   : > { %1937 = vst.msk [vmem:[%s3151_s15 + $0x58] sm:$0xff] %vm1925_vm3, %v1920_v58  ;;  %v1872_v33 = vpop.permute.xlu1 %1871 }
 0x771   : > { %v1917_v34 = vsub.f32 %v2963_v41, %v1872_v33  ;;  %v1877_v11 = vpop.permute.xlu0 %1876 }
 0x772   : > { %v1918_v13 = vsub.f32 %v2965_v42, %v1877_v11 }
 0x773   : > { %1934 = vst.msk [vmem:[%s3151_s15 + $0x40] sm:$0xff] %vm1925_vm3, %v1917_v34 }
 0x774   : > { %1935 = vst.msk [vmem:[%s3151_s15 + $0x48] sm:$0xff] %vm1925_vm3, %v1918_v13  ;;  %v1892_v36 = vpop.permute.xlu1 %1891 }
 0x775   : > { %v1921_v15 = vsub.f32 %v2971_v45, %v1892_v36  ;;  %v1897_v39 = vpop.permute.xlu0 %1896 }
 0x776   : > { %v1922_v17 = vsub.f32 %v2973_v48, %v1897_v39 }
 0x777   : > { %1938 = vst.msk [vmem:[%s3151_s15 + $0x60] sm:$0xff] %vm1925_vm3, %v1921_v15 }
 0x778   : > { %1939 = vst.msk [vmem:[%s3151_s15 + $0x68] sm:$0xff] %vm1925_vm3, %v1922_v17  ;;  %v1902_v56 = vpop.permute.xlu1 %1901 }
 0x779   : > { %v1923_v41 = vsub.f32 %v2977_v49, %v1902_v56  ;;  %v1907_v19 = vpop.permute.xlu0 %1906 }
 0x77a   : > { %v1924_v42 = vsub.f32 %v2981_v50, %v1907_v19 }
 0x77b   : > { %1940 = vst.msk [vmem:[%s3151_s15 + $0x70] sm:$0xff] %vm1925_vm3, %v1923_v41 }
 0x77c   : > { %1941 = vst.msk [vmem:[%s3151_s15 + $0x78] sm:$0xff] %vm1925_vm3, %v1924_v42 }
 0x77d PF: > { %s18_s24 = sadd.s32 1, %s2628_s24  }
 0x77e   : > { %p15_p3 = scmp.ge.s32.totalorder %s18_s24, 4  }
 0x780   :  { %17 = sbr.rel (!%p15_p3) target bundleno = 1 (0x1), region = 89 }
 0x787   :  { %1964 = vsyncpa [#allocation3], 1 }
 0x788   :  { %1966 = vsyncpa [#allocation3 + $0x1], 1 }

</bundles_post_ra>
